<compile_context>
chip_gen: v6e
topology: v6e:2x2x1
jax: 0.10.0
libtpu: 0.0.40
codegen_flags: <defaults>
</compile_context>

<pallas_src>
import jax
import jax.numpy as jnp
from jax import lax
from jax.experimental import pallas as pl
from jax.experimental.pallas import tpu as pltpu

# ---- model config (small, consistent with the module's __init__) ----
VOCAB = 32        # vocab_size
EMB = 16          # embedding_dim
HID = 16          # hidden_dim
OUT = 1           # output_dim
NHEADS = 8        # n_heads
B = 2             # batch (power of two assumed by the in-kernel masks)
S = 8             # sequence length
BS = B * S        # 16 slab rows, s-major: row r = t*B + b
E2 = 2 * HID      # 32  bidirectional feature dim (= attention embed_dim)
HD = E2 // NHEADS # 4   head dim
G8 = 8 * HID      # 128 fused (both-direction) gate width
LN_EPS = 1e-5


def _sigmoid(x):
    # written out with exp so it lowers unambiguously to the EUP
    return 1.0 / (1.0 + jnp.exp(-x))


def summarizer_kernel(ids_ref, w_ref, b_ref, out_ref, y_ref):
    """Whole forward pass.

    ids_ref : (BS, 2) int32; row r = t*B + b, col0 = ids[b, t], col1 = ids[b, S-1-t]
    w_ref   : (160, 128) f32 packed weights   (layout documented in init_params)
    b_ref   : (3, 128)   f32 packed biases
    out_ref : (B, OUT)   f32
    y_ref   : (BS, E2)   f32 VMEM scratch -- bi-LSTM output slab
    """
    f32 = jnp.float32

    # ---------- fused embedding lookup + LSTM input projection (1 matmul) ----------
    # one-hot over [fwd id | VOCAB + bwd id]  -> (BS, 2*VOCAB)
    iota_v = lax.broadcasted_iota(jnp.int32, (BS, 2 * VOCAB), 1)
    id_f = ids_ref[:, 0:1]
    id_b = ids_ref[:, 1:2]
    onehot = ((iota_v == id_f) | (iota_v == id_b + VOCAB)).astype(f32)
    # gates_x[r] = [x_t @ Wih_f.T | x_{S-1-t} @ Wih_b.T]  (gate-interleaved cols) + bias
    gates_x = (jnp.dot(onehot, w_ref[0:2 * VOCAB, :], preferred_element_type=f32)
               + b_ref[0:1, :])                                          # (BS, 8H)

    # ---------- fused bidirectional LSTM recurrence (fully unrolled, S == 8) ----------
    w_hh = w_ref[2 * VOCAB:2 * VOCAB + E2, :]                            # (2H, 8H) block-diag
    h = jnp.zeros((B, E2), f32)                                          # [h_fwd | h_bwd]
    c = jnp.zeros((B, E2), f32)
    for t in range(S):
        g = gates_x[t * B:(t + 1) * B, :] + jnp.dot(h, w_hh, preferred_element_type=f32)
        i_g = _sigmoid(g[:, 0:E2])          # gate cols: [i | f | g | o], each 2H wide
        f_g = _sigmoid(g[:, E2:2 * E2])
        g_g = jnp.tanh(g[:, 2 * E2:3 * E2])
        o_g = _sigmoid(g[:, 3 * E2:4 * E2])
        c = f_g * c + i_g * g_g
        h = o_g * jnp.tanh(c)
        # fwd half belongs to time t, bwd half to time S-1-t; write straight into
        # the slab (no concatenation later).
        y_ref[t * B:(t + 1) * B, 0:HID] = h[:, 0:HID]
        y_ref[(S - 1 - t) * B:(S - t) * B, HID:E2] = h[:, HID:E2]

    # ---------- LayerNorm over the feature dim, whole (BS, E2) slab ----------
    y = y_ref[...]
    mu = jnp.mean(y, axis=-1, keepdims=True)
    var = jnp.mean((y - mu) ** 2, axis=-1, keepdims=True)
    ln = (y - mu) * lax.rsqrt(var + LN_EPS)
    ln = ln * b_ref[2:3, 0:E2] + b_ref[2:3, E2:2 * E2]

    # ---------- multi-head self-attention, all batches & heads together ----------
    w_attn = w_ref[96:128, :]                      # [Wq*scale | Wk | Wv | Wo]
    b_attn = b_ref[1:2, :]
    qkv = (jnp.dot(ln, w_attn[:, 0:3 * E2], preferred_element_type=f32)
           + b_attn[:, 0:3 * E2])                                         # (BS, 3*E2)
    q, k, v = qkv[:, 0:E2], qkv[:, E2:2 * E2], qkv[:, 2 * E2:3 * E2]

    # heads to the leading (batch) axis -> single-batch-dim einsums (flash pattern)
    q3 = jnp.stack([q[:, hh * HD:(hh + 1) * HD] for hh in range(NHEADS)], axis=0)
    k3 = jnp.stack([k[:, hh * HD:(hh + 1) * HD] for hh in range(NHEADS)], axis=0)
    v3 = jnp.stack([v[:, hh * HD:(hh + 1) * HD] for hh in range(NHEADS)], axis=0)

    # block-diagonal batch mask: rows are s-major (r = t*B + b); same batch iff
    # (r & (B-1)) == (r' & (B-1)).  (B is a power of two.)
    ri = lax.broadcasted_iota(jnp.int32, (BS, BS), 0)
    ci = lax.broadcasted_iota(jnp.int32, (BS, BS), 1)
    same_batch = jnp.bitwise_and(ri, B - 1) == jnp.bitwise_and(ci, B - 1)
    mask = jnp.where(same_batch, 0.0, -1e30).astype(f32)                  # (BS, BS)

    scores = jnp.einsum('hsd,htd->hst', q3, k3, preferred_element_type=f32) + mask
    scores = scores - jnp.max(scores, axis=-1, keepdims=True)             # one batched softmax
    p = jnp.exp(scores)
    p = p * pl.reciprocal(jnp.sum(p, axis=-1, keepdims=True), approx=True)
    ctx3 = jnp.einsum('hst,htd->hsd', p, v3, preferred_element_type=f32)  # (NH, BS, HD)
    ctx = jnp.concatenate([ctx3[hh] for hh in range(NHEADS)], axis=-1)    # (BS, E2)
    attn = (jnp.dot(ctx, w_attn[:, 3 * E2:4 * E2], preferred_element_type=f32)
            + b_attn[:, 3 * E2:4 * E2])                                   # (BS, E2)

    # ---------- Conv1d(k=3, pad=1) + mean over time, collapsed ----------
    # mean_t conv(attn)[b] = colsum_b(attn) @ (W0+W1+W2)/S
    #                        - attn[b, S-1] @ W0/S - attn[b, 0] @ W2/S + conv_b
    w_head = w_ref[128:160, :]
    wc_sum = w_head[:, 0:HID]
    wc0 = w_head[:, HID:2 * HID]
    wc2 = w_head[:, 2 * HID:3 * HID]
    # per-batch column sums via a tiny selector matmul (rows are s-major)
    rb = lax.broadcasted_iota(jnp.int32, (B, BS), 0)
    cb = lax.broadcasted_iota(jnp.int32, (B, BS), 1)
    sel = (jnp.bitwise_and(cb, B - 1) == rb).astype(f32)                  # (B, BS)
    s_full = jnp.dot(sel, attn, preferred_element_type=f32)               # (B, E2)
    row_t0 = attn[0:B, :]                    # time step 0, batches 0..B-1
    row_tl = attn[(S - 1) * B:S * B, :]      # time step S-1
    pooled = (jnp.dot(s_full, wc_sum, preferred_element_type=f32)
              - jnp.dot(row_tl, wc0, preferred_element_type=f32)
              - jnp.dot(row_t0, wc2, preferred_element_type=f32)
              + b_ref[2:3, 2 * E2:2 * E2 + HID])                          # (B, HID)

    # ---------- MLP head + sigmoid (dropouts = eval-mode identity) ----------
    fc1w = w_head[0:HID, 3 * HID:3 * HID + HID // 2]                      # (HID, HID//2)
    fc2w = w_head[0:HID // 2, 3 * HID + HID // 2:3 * HID + HID // 2 + OUT]
    fc1b = b_ref[2:3, 2 * E2 + HID:2 * E2 + HID + HID // 2]
    fc2b = b_ref[2:3, 2 * E2 + HID + HID // 2:2 * E2 + HID + HID // 2 + OUT]
    h1 = jnp.maximum(jnp.dot(pooled, fc1w, preferred_element_type=f32) + fc1b, 0.0)
    logit = jnp.dot(h1, fc2w, preferred_element_type=f32) + fc2b          # (B, OUT)
    out_ref[...] = _sigmoid(logit)


def init_params(key):
    """Deterministic synthetic parameters, pre-packed / pre-fused for the kernel.

    w_all (160, 128) f32:
      rows   0: 64  blockdiag(emb_table @ Wih_f.T, emb_table @ Wih_b.T), gate-interleaved cols
      rows  64: 96  blockdiag(Whh_f.T, Whh_b.T), gate-interleaved cols
      rows  96:128  [Wq.T/sqrt(HD) | Wk.T | Wv.T | Wo.T]
      rows 128:160  [(W0+W1+W2)/S | W0/S | W2/S | fc1.T (rows 0:16) | fc2.T (rows 0:8) | 0]
    b_all (3, 128) f32:
      row 0  gate-interleaved LSTM bias (b_ih + b_hh, both directions)
      row 1  [bq/sqrt(HD) | bk | bv | bo]
      row 2  [ln_g | ln_b | conv_b | fc1_b | fc2_b | 0]
    Gate-interleaved column order: [i_f, i_b, f_f, f_b, g_f, g_b, o_f, o_b] (each HID wide).
    """
    ks = iter(jax.random.split(key, 24))
    n = lambda shape, s=0.1: jax.random.normal(next(ks), shape, jnp.float32) * s

    emb_table = n((VOCAB, EMB))

    # LSTM (layer 0, both directions); PyTorch shapes: w_ih (4H,E), w_hh (4H,H)
    wih_f, whh_f = n((4 * HID, EMB)), n((4 * HID, HID))
    bih_f, bhh_f = n((4 * HID,)), n((4 * HID,))
    wih_b, whh_b = n((4 * HID, EMB)), n((4 * HID, HID))
    bih_b, bhh_b = n((4 * HID,)), n((4 * HID,))

    ln_g = jnp.ones((E2,), jnp.float32)
    ln_b = jnp.zeros((E2,), jnp.float32)

    in_proj_w = n((3 * E2, E2))      # [Wq; Wk; Wv]
    in_proj_b = n((3 * E2,))
    out_proj_w = n((E2, E2))
    out_proj_b = n((E2,))

    conv_w = n((HID, E2, 3))         # PyTorch Conv1d weight (out_c, in_c, K)
    conv_b = n((HID,))

    fc1_w, fc1_b = n((HID // 2, HID)), n((HID // 2,))
    fc2_w, fc2_b = n((OUT, HID // 2)), n((OUT,))

    def fuse_dirs(a_f, a_b):
        # (Rf, 4H) fwd + (Rb, 4H) bwd -> (Rf+Rb, 8H) block-diagonal, gate-interleaved cols
        rf, rb = a_f.shape[0], a_b.shape[0]
        cols = []
        for gi in range(4):
            cols.append(jnp.concatenate(
                [a_f[:, gi * HID:(gi + 1) * HID], jnp.zeros((rb, HID), jnp.float32)], axis=0))
            cols.append(jnp.concatenate(
                [jnp.zeros((rf, HID), jnp.float32), a_b[:, gi * HID:(gi + 1) * HID]], axis=0))
        return jnp.concatenate(cols, axis=1)

    def interleave_bias(bf, bb):
        parts = []
        for gi in range(4):
            parts.append(bf[gi * HID:(gi + 1) * HID])
            parts.append(bb[gi * HID:(gi + 1) * HID])
        return jnp.concatenate(parts)

    w_emb_gates = fuse_dirs(emb_table @ wih_f.T, emb_table @ wih_b.T)   # (64, 128)
    w_hh_both = fuse_dirs(whh_f.T, whh_b.T)                             # (32, 128)
    b_lstm = interleave_bias(bih_f + bhh_f, bih_b + bhh_b)              # (128,)

    scale = 1.0 / float(HD) ** 0.5
    wq, wk, wv = in_proj_w[0:E2], in_proj_w[E2:2 * E2], in_proj_w[2 * E2:]
    bq, bk, bv = in_proj_b[0:E2], in_proj_b[E2:2 * E2], in_proj_b[2 * E2:]
    w_attn = jnp.concatenate([wq.T * scale, wk.T, wv.T, out_proj_w.T], axis=1)  # (32, 128)
    b_attn = jnp.concatenate([bq * scale, bk, bv, out_proj_b])                  # (128,)

    w0 = conv_w[:, :, 0].T / S       # (E2, HID), 1/S (mean) folded in
    w1 = conv_w[:, :, 1].T / S
    w2 = conv_w[:, :, 2].T / S
    w_head = jnp.zeros((E2, 128), jnp.float32)
    w_head = w_head.at[:, 0:HID].set(w0 + w1 + w2)
    w_head = w_head.at[:, HID:2 * HID].set(w0)
    w_head = w_head.at[:, 2 * HID:3 * HID].set(w2)
    w_head = w_head.at[0:HID, 3 * HID:3 * HID + HID // 2].set(fc1_w.T)
    w_head = w_head.at[0:HID // 2, 3 * HID + HID // 2:3 * HID + HID // 2 + OUT].set(fc2_w.T)

    w_all = jnp.concatenate([w_emb_gates, w_hh_both, w_attn, w_head], axis=0)   # (160, 128)

    b_misc = jnp.zeros((128,), jnp.float32)
    b_misc = b_misc.at[0:E2].set(ln_g)
    b_misc = b_misc.at[E2:2 * E2].set(ln_b)
    b_misc = b_misc.at[2 * E2:2 * E2 + HID].set(conv_b)
    b_misc = b_misc.at[2 * E2 + HID:2 * E2 + HID + HID // 2].set(fc1_b)
    b_misc = b_misc.at[2 * E2 + HID + HID // 2:2 * E2 + HID + HID // 2 + OUT].set(fc2_b)

    b_all = jnp.stack([b_lstm, b_attn, b_misc], axis=0)                 # (3, 128)

    return dict(w_all=w_all, b_all=b_all)


def extractive_summarizer(input_ids, attention_mask, params):
    # attention_mask is unused in the reference forward; kept for signature parity.
    del attention_mask
    # Only tiny int32 index prep here (128 bytes); the embedding gather itself is a
    # one-hot matmul inside the kernel, so no embedded activations hit HBM.
    ids_t = jnp.transpose(input_ids.astype(jnp.int32), (1, 0))          # (S, B)
    ids_pair = jnp.stack([ids_t, ids_t[::-1]], axis=-1).reshape(S * B, 2)

    vmem = pl.BlockSpec(memory_space=pltpu.MemorySpace.VMEM)
    out = pl.pallas_call(
        summarizer_kernel,
        out_shape=jax.ShapeDtypeStruct((B, OUT), jnp.float32),
        in_specs=[vmem, vmem, vmem],          # 3 dense inputs instead of 23
        out_specs=vmem,
        scratch_shapes=[pltpu.VMEM((S * B, E2), jnp.float32)],  # bi-LSTM output slab
    )(ids_pair, params["w_all"], params["b_all"])
    return jnp.squeeze(out, axis=1)           # (B,) -- matches .squeeze(1)


if __name__ == "__main__":
    key = jax.random.PRNGKey(0)
    pkey, ikey = jax.random.split(key)
    params = init_params(pkey)

    input_ids = jax.random.randint(ikey, (B, S), 0, VOCAB, dtype=jnp.int32)
    attention_mask = jnp.ones((B, S), jnp.int32)

    fwd = jax.jit(extractive_summarizer)
    out = fwd(input_ids, attention_mask, params)
    jax.block_until_ready(out)
    assert out.shape == (B,)
    assert bool(jnp.all(jnp.isfinite(out))) and bool(jnp.all((out > 0.0) & (out < 1.0)))
    print("KERNEL_OK")
</pallas_src>

<mosaic_0001>
module attributes {stable_mosaic.version = 11 : i64} {
  func.func @summarizer_kernel(%arg0: memref<16x2xi32, #tpu.memory_space<vmem>>, %arg1: memref<160x128xf32, #tpu.memory_space<vmem>>, %arg2: memref<3x128xf32, #tpu.memory_space<vmem>>, %arg3: memref<2x1xf32, #tpu.memory_space<vmem>>, %arg4: memref<16x32xf32, #tpu.memory_space<vmem>>) attributes {dimension_semantics = [], scalar_prefetch = 0 : i64, scratch_operands = 1 : i64, tpu.core_type = #tpu.core_type<tc>} {
    %0 = tpu.iota {dimensions = array<i32: 1>} : vector<16x64xi32>
    %c0 = arith.constant 0 : index
    %c0_0 = arith.constant 0 : index
    %1 = vector.load %arg0[%c0, %c0_0] : memref<16x2xi32, #tpu.memory_space<vmem>>, vector<16x1xi32>
    %c0_1 = arith.constant 0 : index
    %c1 = arith.constant 1 : index
    %2 = vector.load %arg0[%c0_1, %c1] : memref<16x2xi32, #tpu.memory_space<vmem>>, vector<16x1xi32>
    %3 = vector.broadcast %1 : vector<16x1xi32> to vector<16x64xi32>
    %4 = arith.cmpi eq, %0, %3 : vector<16x64xi32>
    %c32_i32 = arith.constant 32 : i32
    %5 = vector.broadcast %c32_i32 : i32 to vector<16x1xi32>
    %6 = arith.addi %2, %5 : vector<16x1xi32>
    %7 = vector.broadcast %6 : vector<16x1xi32> to vector<16x64xi32>
    %8 = arith.cmpi eq, %0, %7 : vector<16x64xi32>
    %9 = arith.ori %4, %8 : vector<16x64xi1>
    %10 = arith.extui %9 : vector<16x64xi1> to vector<16x64xi32>
    %11 = arith.sitofp %10 : vector<16x64xi32> to vector<16x64xf32>
    %c0_2 = arith.constant 0 : index
    %c0_3 = arith.constant 0 : index
    %12 = vector.load %arg1[%c0_2, %c0_3] : memref<160x128xf32, #tpu.memory_space<vmem>>, vector<64x128xf32>
    %cst = arith.constant dense<0.000000e+00> : vector<16x128xf32>
    %13 = tpu.matmul %11, %12, %cst {dimension_numbers = #tpu.dot_dimension_numbers<[1], [0], [0], [1], [0, 0, 1, 1], [], []>} : vector<16x64xf32>, vector<64x128xf32>, vector<16x128xf32> -> vector<16x128xf32>
    %c0_4 = arith.constant 0 : index
    %c0_5 = arith.constant 0 : index
    %14 = vector.load %arg2[%c0_4, %c0_5] : memref<3x128xf32, #tpu.memory_space<vmem>>, vector<1x128xf32>
    %15 = vector.broadcast %14 : vector<1x128xf32> to vector<16x128xf32>
    %16 = arith.addf %13, %15 : vector<16x128xf32>
    %c64 = arith.constant 64 : index
    %c0_6 = arith.constant 0 : index
    %17 = vector.load %arg1[%c64, %c0_6] : memref<160x128xf32, #tpu.memory_space<vmem>>, vector<32x128xf32>
    %cst_7 = arith.constant 0.000000e+00 : f32
    %18 = vector.broadcast %cst_7 : f32 to vector<2x32xf32>
    %cst_8 = arith.constant 0.000000e+00 : f32
    %19 = vector.broadcast %cst_8 : f32 to vector<2x32xf32>
    %20 = vector.extract_strided_slice %16 {offsets = [0, 0], sizes = [2, 128], strides = [1, 1]} : vector<16x128xf32> to vector<2x128xf32>
    %cst_9 = arith.constant dense<0.000000e+00> : vector<2x128xf32>
    %21 = tpu.matmul %18, %17, %cst_9 {dimension_numbers = #tpu.dot_dimension_numbers<[1], [0], [0], [1], [0, 0, 1, 1], [], []>} : vector<2x32xf32>, vector<32x128xf32>, vector<2x128xf32> -> vector<2x128xf32>
    %22 = arith.addf %20, %21 : vector<2x128xf32>
    %23 = vector.extract_strided_slice %22 {offsets = [0, 0], sizes = [2, 32], strides = [1, 1]} : vector<2x128xf32> to vector<2x32xf32>
    %cst_10 = arith.constant 0.000000e+00 : f32
    %24 = vector.broadcast %cst_10 : f32 to vector<2x32xf32>
    %25 = arith.subf %24, %23 : vector<2x32xf32>
    %26 = math.exp %25 : vector<2x32xf32>
    %cst_11 = arith.constant 1.000000e+00 : f32
    %27 = vector.broadcast %cst_11 : f32 to vector<2x32xf32>
    %28 = arith.addf %27, %26 : vector<2x32xf32>
    %cst_12 = arith.constant 1.000000e+00 : f32
    %29 = vector.broadcast %cst_12 : f32 to vector<2x32xf32>
    %30 = arith.divf %29, %28 : vector<2x32xf32>
    %31 = vector.extract_strided_slice %22 {offsets = [0, 32], sizes = [2, 32], strides = [1, 1]} : vector<2x128xf32> to vector<2x32xf32>
    %cst_13 = arith.constant 0.000000e+00 : f32
    %32 = vector.broadcast %cst_13 : f32 to vector<2x32xf32>
    %33 = arith.subf %32, %31 : vector<2x32xf32>
    %34 = math.exp %33 : vector<2x32xf32>
    %cst_14 = arith.constant 1.000000e+00 : f32
    %35 = vector.broadcast %cst_14 : f32 to vector<2x32xf32>
    %36 = arith.addf %35, %34 : vector<2x32xf32>
    %cst_15 = arith.constant 1.000000e+00 : f32
    %37 = vector.broadcast %cst_15 : f32 to vector<2x32xf32>
    %38 = arith.divf %37, %36 : vector<2x32xf32>
    %39 = vector.extract_strided_slice %22 {offsets = [0, 64], sizes = [2, 32], strides = [1, 1]} : vector<2x128xf32> to vector<2x32xf32>
    %40 = math.tanh %39 : vector<2x32xf32>
    %41 = vector.extract_strided_slice %22 {offsets = [0, 96], sizes = [2, 32], strides = [1, 1]} : vector<2x128xf32> to vector<2x32xf32>
    %cst_16 = arith.constant 0.000000e+00 : f32
    %42 = vector.broadcast %cst_16 : f32 to vector<2x32xf32>
    %43 = arith.subf %42, %41 : vector<2x32xf32>
    %44 = math.exp %43 : vector<2x32xf32>
    %cst_17 = arith.constant 1.000000e+00 : f32
    %45 = vector.broadcast %cst_17 : f32 to vector<2x32xf32>
    %46 = arith.addf %45, %44 : vector<2x32xf32>
    %cst_18 = arith.constant 1.000000e+00 : f32
    %47 = vector.broadcast %cst_18 : f32 to vector<2x32xf32>
    %48 = arith.divf %47, %46 : vector<2x32xf32>
    %49 = arith.mulf %38, %19 : vector<2x32xf32>
    %50 = arith.mulf %30, %40 : vector<2x32xf32>
    %51 = arith.addf %49, %50 : vector<2x32xf32>
    %52 = math.tanh %51 : vector<2x32xf32>
    %53 = arith.mulf %48, %52 : vector<2x32xf32>
    %54 = vector.extract_strided_slice %53 {offsets = [0, 0], sizes = [2, 16], strides = [1, 1]} : vector<2x32xf32> to vector<2x16xf32>
    %c0_19 = arith.constant 0 : index
    %c0_20 = arith.constant 0 : index
    %55 = vector.load %arg4[%c0_19, %c0_20] : memref<16x32xf32, #tpu.memory_space<vmem>>, vector<2x16xf32>
    tpu.vector_store %arg4[%c0_19, %c0_20], %54 {strides = array<i32>} : memref<16x32xf32, #tpu.memory_space<vmem>>, vector<2x16xf32>,
    %56 = vector.extract_strided_slice %53 {offsets = [0, 16], sizes = [2, 16], strides = [1, 1]} : vector<2x32xf32> to vector<2x16xf32>
    %c14 = arith.constant 14 : index
    %c16 = arith.constant 16 : index
    %57 = vector.load %arg4[%c14, %c16] : memref<16x32xf32, #tpu.memory_space<vmem>>, vector<2x16xf32>
    tpu.vector_store %arg4[%c14, %c16], %56 {strides = array<i32>} : memref<16x32xf32, #tpu.memory_space<vmem>>, vector<2x16xf32>,
    %58 = vector.extract_strided_slice %16 {offsets = [2, 0], sizes = [2, 128], strides = [1, 1]} : vector<16x128xf32> to vector<2x128xf32>
    %cst_21 = arith.constant dense<0.000000e+00> : vector<2x128xf32>
    %59 = tpu.matmul %53, %17, %cst_21 {dimension_numbers = #tpu.dot_dimension_numbers<[1], [0], [0], [1], [0, 0, 1, 1], [], []>} : vector<2x32xf32>, vector<32x128xf32>, vector<2x128xf32> -> vector<2x128xf32>
    %60 = arith.addf %58, %59 : vector<2x128xf32>
    %61 = vector.extract_strided_slice %60 {offsets = [0, 0], sizes = [2, 32], strides = [1, 1]} : vector<2x128xf32> to vector<2x32xf32>
    %cst_22 = arith.constant 0.000000e+00 : f32
    %62 = vector.broadcast %cst_22 : f32 to vector<2x32xf32>
    %63 = arith.subf %62, %61 : vector<2x32xf32>
    %64 = math.exp %63 : vector<2x32xf32>
    %cst_23 = arith.constant 1.000000e+00 : f32
    %65 = vector.broadcast %cst_23 : f32 to vector<2x32xf32>
    %66 = arith.addf %65, %64 : vector<2x32xf32>
    %cst_24 = arith.constant 1.000000e+00 : f32
    %67 = vector.broadcast %cst_24 : f32 to vector<2x32xf32>
    %68 = arith.divf %67, %66 : vector<2x32xf32>
    %69 = vector.extract_strided_slice %60 {offsets = [0, 32], sizes = [2, 32], strides = [1, 1]} : vector<2x128xf32> to vector<2x32xf32>
    %cst_25 = arith.constant 0.000000e+00 : f32
    %70 = vector.broadcast %cst_25 : f32 to vector<2x32xf32>
    %71 = arith.subf %70, %69 : vector<2x32xf32>
    %72 = math.exp %71 : vector<2x32xf32>
    %cst_26 = arith.constant 1.000000e+00 : f32
    %73 = vector.broadcast %cst_26 : f32 to vector<2x32xf32>
    %74 = arith.addf %73, %72 : vector<2x32xf32>
    %cst_27 = arith.constant 1.000000e+00 : f32
    %75 = vector.broadcast %cst_27 : f32 to vector<2x32xf32>
    %76 = arith.divf %75, %74 : vector<2x32xf32>
    %77 = vector.extract_strided_slice %60 {offsets = [0, 64], sizes = [2, 32], strides = [1, 1]} : vector<2x128xf32> to vector<2x32xf32>
    %78 = math.tanh %77 : vector<2x32xf32>
    %79 = vector.extract_strided_slice %60 {offsets = [0, 96], sizes = [2, 32], strides = [1, 1]} : vector<2x128xf32> to vector<2x32xf32>
    %cst_28 = arith.constant 0.000000e+00 : f32
    %80 = vector.broadcast %cst_28 : f32 to vector<2x32xf32>
    %81 = arith.subf %80, %79 : vector<2x32xf32>
    %82 = math.exp %81 : vector<2x32xf32>
    %cst_29 = arith.constant 1.000000e+00 : f32
    %83 = vector.broadcast %cst_29 : f32 to vector<2x32xf32>
    %84 = arith.addf %83, %82 : vector<2x32xf32>
    %cst_30 = arith.constant 1.000000e+00 : f32
    %85 = vector.broadcast %cst_30 : f32 to vector<2x32xf32>
    %86 = arith.divf %85, %84 : vector<2x32xf32>
    %87 = arith.mulf %76, %51 : vector<2x32xf32>
    %88 = arith.mulf %68, %78 : vector<2x32xf32>
    %89 = arith.addf %87, %88 : vector<2x32xf32>
    %90 = math.tanh %89 : vector<2x32xf32>
    %91 = arith.mulf %86, %90 : vector<2x32xf32>
    %92 = vector.extract_strided_slice %91 {offsets = [0, 0], sizes = [2, 16], strides = [1, 1]} : vector<2x32xf32> to vector<2x16xf32>
    %c2 = arith.constant 2 : index
    %c0_31 = arith.constant 0 : index
    %93 = vector.load %arg4[%c2, %c0_31] : memref<16x32xf32, #tpu.memory_space<vmem>>, vector<2x16xf32>
    tpu.vector_store %arg4[%c2, %c0_31], %92 {strides = array<i32>} : memref<16x32xf32, #tpu.memory_space<vmem>>, vector<2x16xf32>,
    %94 = vector.extract_strided_slice %91 {offsets = [0, 16], sizes = [2, 16], strides = [1, 1]} : vector<2x32xf32> to vector<2x16xf32>
    %c12 = arith.constant 12 : index
    %c16_32 = arith.constant 16 : index
    %95 = vector.load %arg4[%c12, %c16_32] : memref<16x32xf32, #tpu.memory_space<vmem>>, vector<2x16xf32>
    tpu.vector_store %arg4[%c12, %c16_32], %94 {strides = array<i32>} : memref<16x32xf32, #tpu.memory_space<vmem>>, vector<2x16xf32>,
    %96 = vector.extract_strided_slice %16 {offsets = [4, 0], sizes = [2, 128], strides = [1, 1]} : vector<16x128xf32> to vector<2x128xf32>
    %cst_33 = arith.constant dense<0.000000e+00> : vector<2x128xf32>
    %97 = tpu.matmul %91, %17, %cst_33 {dimension_numbers = #tpu.dot_dimension_numbers<[1], [0], [0], [1], [0, 0, 1, 1], [], []>} : vector<2x32xf32>, vector<32x128xf32>, vector<2x128xf32> -> vector<2x128xf32>
    %98 = arith.addf %96, %97 : vector<2x128xf32>
    %99 = vector.extract_strided_slice %98 {offsets = [0, 0], sizes = [2, 32], strides = [1, 1]} : vector<2x128xf32> to vector<2x32xf32>
    %cst_34 = arith.constant 0.000000e+00 : f32
    %100 = vector.broadcast %cst_34 : f32 to vector<2x32xf32>
    %101 = arith.subf %100, %99 : vector<2x32xf32>
    %102 = math.exp %101 : vector<2x32xf32>
    %cst_35 = arith.constant 1.000000e+00 : f32
    %103 = vector.broadcast %cst_35 : f32 to vector<2x32xf32>
    %104 = arith.addf %103, %102 : vector<2x32xf32>
    %cst_36 = arith.constant 1.000000e+00 : f32
    %105 = vector.broadcast %cst_36 : f32 to vector<2x32xf32>
    %106 = arith.divf %105, %104 : vector<2x32xf32>
    %107 = vector.extract_strided_slice %98 {offsets = [0, 32], sizes = [2, 32], strides = [1, 1]} : vector<2x128xf32> to vector<2x32xf32>
    %cst_37 = arith.constant 0.000000e+00 : f32
    %108 = vector.broadcast %cst_37 : f32 to vector<2x32xf32>
    %109 = arith.subf %108, %107 : vector<2x32xf32>
    %110 = math.exp %109 : vector<2x32xf32>
    %cst_38 = arith.constant 1.000000e+00 : f32
    %111 = vector.broadcast %cst_38 : f32 to vector<2x32xf32>
    %112 = arith.addf %111, %110 : vector<2x32xf32>
    %cst_39 = arith.constant 1.000000e+00 : f32
    %113 = vector.broadcast %cst_39 : f32 to vector<2x32xf32>
    %114 = arith.divf %113, %112 : vector<2x32xf32>
    %115 = vector.extract_strided_slice %98 {offsets = [0, 64], sizes = [2, 32], strides = [1, 1]} : vector<2x128xf32> to vector<2x32xf32>
    %116 = math.tanh %115 : vector<2x32xf32>
    %117 = vector.extract_strided_slice %98 {offsets = [0, 96], sizes = [2, 32], strides = [1, 1]} : vector<2x128xf32> to vector<2x32xf32>
    %cst_40 = arith.constant 0.000000e+00 : f32
    %118 = vector.broadcast %cst_40 : f32 to vector<2x32xf32>
    %119 = arith.subf %118, %117 : vector<2x32xf32>
    %120 = math.exp %119 : vector<2x32xf32>
    %cst_41 = arith.constant 1.000000e+00 : f32
    %121 = vector.broadcast %cst_41 : f32 to vector<2x32xf32>
    %122 = arith.addf %121, %120 : vector<2x32xf32>
    %cst_42 = arith.constant 1.000000e+00 : f32
    %123 = vector.broadcast %cst_42 : f32 to vector<2x32xf32>
    %124 = arith.divf %123, %122 : vector<2x32xf32>
    %125 = arith.mulf %114, %89 : vector<2x32xf32>
    %126 = arith.mulf %106, %116 : vector<2x32xf32>
    %127 = arith.addf %125, %126 : vector<2x32xf32>
    %128 = math.tanh %127 : vector<2x32xf32>
    %129 = arith.mulf %124, %128 : vector<2x32xf32>
    %130 = vector.extract_strided_slice %129 {offsets = [0, 0], sizes = [2, 16], strides = [1, 1]} : vector<2x32xf32> to vector<2x16xf32>
    %c4 = arith.constant 4 : index
    %c0_43 = arith.constant 0 : index
    %131 = vector.load %arg4[%c4, %c0_43] : memref<16x32xf32, #tpu.memory_space<vmem>>, vector<2x16xf32>
    tpu.vector_store %arg4[%c4, %c0_43], %130 {strides = array<i32>} : memref<16x32xf32, #tpu.memory_space<vmem>>, vector<2x16xf32>,
    %132 = vector.extract_strided_slice %129 {offsets = [0, 16], sizes = [2, 16], strides = [1, 1]} : vector<2x32xf32> to vector<2x16xf32>
    %c10 = arith.constant 10 : index
    %c16_44 = arith.constant 16 : index
    %133 = vector.load %arg4[%c10, %c16_44] : memref<16x32xf32, #tpu.memory_space<vmem>>, vector<2x16xf32>
    tpu.vector_store %arg4[%c10, %c16_44], %132 {strides = array<i32>} : memref<16x32xf32, #tpu.memory_space<vmem>>, vector<2x16xf32>,
    %134 = vector.extract_strided_slice %16 {offsets = [6, 0], sizes = [2, 128], strides = [1, 1]} : vector<16x128xf32> to vector<2x128xf32>
    %cst_45 = arith.constant dense<0.000000e+00> : vector<2x128xf32>
    %135 = tpu.matmul %129, %17, %cst_45 {dimension_numbers = #tpu.dot_dimension_numbers<[1], [0], [0], [1], [0, 0, 1, 1], [], []>} : vector<2x32xf32>, vector<32x128xf32>, vector<2x128xf32> -> vector<2x128xf32>
    %136 = arith.addf %134, %135 : vector<2x128xf32>
    %137 = vector.extract_strided_slice %136 {offsets = [0, 0], sizes = [2, 32], strides = [1, 1]} : vector<2x128xf32> to vector<2x32xf32>
    %cst_46 = arith.constant 0.000000e+00 : f32
    %138 = vector.broadcast %cst_46 : f32 to vector<2x32xf32>
    %139 = arith.subf %138, %137 : vector<2x32xf32>
    %140 = math.exp %139 : vector<2x32xf32>
    %cst_47 = arith.constant 1.000000e+00 : f32
    %141 = vector.broadcast %cst_47 : f32 to vector<2x32xf32>
    %142 = arith.addf %141, %140 : vector<2x32xf32>
    %cst_48 = arith.constant 1.000000e+00 : f32
    %143 = vector.broadcast %cst_48 : f32 to vector<2x32xf32>
    %144 = arith.divf %143, %142 : vector<2x32xf32>
    %145 = vector.extract_strided_slice %136 {offsets = [0, 32], sizes = [2, 32], strides = [1, 1]} : vector<2x128xf32> to vector<2x32xf32>
    %cst_49 = arith.constant 0.000000e+00 : f32
    %146 = vector.broadcast %cst_49 : f32 to vector<2x32xf32>
    %147 = arith.subf %146, %145 : vector<2x32xf32>
    %148 = math.exp %147 : vector<2x32xf32>
    %cst_50 = arith.constant 1.000000e+00 : f32
    %149 = vector.broadcast %cst_50 : f32 to vector<2x32xf32>
    %150 = arith.addf %149, %148 : vector<2x32xf32>
    %cst_51 = arith.constant 1.000000e+00 : f32
    %151 = vector.broadcast %cst_51 : f32 to vector<2x32xf32>
    %152 = arith.divf %151, %150 : vector<2x32xf32>
    %153 = vector.extract_strided_slice %136 {offsets = [0, 64], sizes = [2, 32], strides = [1, 1]} : vector<2x128xf32> to vector<2x32xf32>
    %154 = math.tanh %153 : vector<2x32xf32>
    %155 = vector.extract_strided_slice %136 {offsets = [0, 96], sizes = [2, 32], strides = [1, 1]} : vector<2x128xf32> to vector<2x32xf32>
    %cst_52 = arith.constant 0.000000e+00 : f32
    %156 = vector.broadcast %cst_52 : f32 to vector<2x32xf32>
    %157 = arith.subf %156, %155 : vector<2x32xf32>
    %158 = math.exp %157 : vector<2x32xf32>
    %cst_53 = arith.constant 1.000000e+00 : f32
    %159 = vector.broadcast %cst_53 : f32 to vector<2x32xf32>
    %160 = arith.addf %159, %158 : vector<2x32xf32>
    %cst_54 = arith.constant 1.000000e+00 : f32
    %161 = vector.broadcast %cst_54 : f32 to vector<2x32xf32>
    %162 = arith.divf %161, %160 : vector<2x32xf32>
    %163 = arith.mulf %152, %127 : vector<2x32xf32>
    %164 = arith.mulf %144, %154 : vector<2x32xf32>
    %165 = arith.addf %163, %164 : vector<2x32xf32>
    %166 = math.tanh %165 : vector<2x32xf32>
    %167 = arith.mulf %162, %166 : vector<2x32xf32>
    %168 = vector.extract_strided_slice %167 {offsets = [0, 0], sizes = [2, 16], strides = [1, 1]} : vector<2x32xf32> to vector<2x16xf32>
    %c6 = arith.constant 6 : index
    %c0_55 = arith.constant 0 : index
    %169 = vector.load %arg4[%c6, %c0_55] : memref<16x32xf32, #tpu.memory_space<vmem>>, vector<2x16xf32>
    tpu.vector_store %arg4[%c6, %c0_55], %168 {strides = array<i32>} : memref<16x32xf32, #tpu.memory_space<vmem>>, vector<2x16xf32>,
    %170 = vector.extract_strided_slice %167 {offsets = [0, 16], sizes = [2, 16], strides = [1, 1]} : vector<2x32xf32> to vector<2x16xf32>
    %c8 = arith.constant 8 : index
    %c16_56 = arith.constant 16 : index
    %171 = vector.load %arg4[%c8, %c16_56] : memref<16x32xf32, #tpu.memory_space<vmem>>, vector<2x16xf32>
    tpu.vector_store %arg4[%c8, %c16_56], %170 {strides = array<i32>} : memref<16x32xf32, #tpu.memory_space<vmem>>, vector<2x16xf32>,
    %172 = vector.extract_strided_slice %16 {offsets = [8, 0], sizes = [2, 128], strides = [1, 1]} : vector<16x128xf32> to vector<2x128xf32>
    %cst_57 = arith.constant dense<0.000000e+00> : vector<2x128xf32>
    %173 = tpu.matmul %167, %17, %cst_57 {dimension_numbers = #tpu.dot_dimension_numbers<[1], [0], [0], [1], [0, 0, 1, 1], [], []>} : vector<2x32xf32>, vector<32x128xf32>, vector<2x128xf32> -> vector<2x128xf32>
    %174 = arith.addf %172, %173 : vector<2x128xf32>
    %175 = vector.extract_strided_slice %174 {offsets = [0, 0], sizes = [2, 32], strides = [1, 1]} : vector<2x128xf32> to vector<2x32xf32>
    %cst_58 = arith.constant 0.000000e+00 : f32
    %176 = vector.broadcast %cst_58 : f32 to vector<2x32xf32>
    %177 = arith.subf %176, %175 : vector<2x32xf32>
    %178 = math.exp %177 : vector<2x32xf32>
    %cst_59 = arith.constant 1.000000e+00 : f32
    %179 = vector.broadcast %cst_59 : f32 to vector<2x32xf32>
    %180 = arith.addf %179, %178 : vector<2x32xf32>
    %cst_60 = arith.constant 1.000000e+00 : f32
    %181 = vector.broadcast %cst_60 : f32 to vector<2x32xf32>
    %182 = arith.divf %181, %180 : vector<2x32xf32>
    %183 = vector.extract_strided_slice %174 {offsets = [0, 32], sizes = [2, 32], strides = [1, 1]} : vector<2x128xf32> to vector<2x32xf32>
    %cst_61 = arith.constant 0.000000e+00 : f32
    %184 = vector.broadcast %cst_61 : f32 to vector<2x32xf32>
    %185 = arith.subf %184, %183 : vector<2x32xf32>
    %186 = math.exp %185 : vector<2x32xf32>
    %cst_62 = arith.constant 1.000000e+00 : f32
    %187 = vector.broadcast %cst_62 : f32 to vector<2x32xf32>
    %188 = arith.addf %187, %186 : vector<2x32xf32>
    %cst_63 = arith.constant 1.000000e+00 : f32
    %189 = vector.broadcast %cst_63 : f32 to vector<2x32xf32>
    %190 = arith.divf %189, %188 : vector<2x32xf32>
    %191 = vector.extract_strided_slice %174 {offsets = [0, 64], sizes = [2, 32], strides = [1, 1]} : vector<2x128xf32> to vector<2x32xf32>
    %192 = math.tanh %191 : vector<2x32xf32>
    %193 = vector.extract_strided_slice %174 {offsets = [0, 96], sizes = [2, 32], strides = [1, 1]} : vector<2x128xf32> to vector<2x32xf32>
    %cst_64 = arith.constant 0.000000e+00 : f32
    %194 = vector.broadcast %cst_64 : f32 to vector<2x32xf32>
    %195 = arith.subf %194, %193 : vector<2x32xf32>
    %196 = math.exp %195 : vector<2x32xf32>
    %cst_65 = arith.constant 1.000000e+00 : f32
    %197 = vector.broadcast %cst_65 : f32 to vector<2x32xf32>
    %198 = arith.addf %197, %196 : vector<2x32xf32>
    %cst_66 = arith.constant 1.000000e+00 : f32
    %199 = vector.broadcast %cst_66 : f32 to vector<2x32xf32>
    %200 = arith.divf %199, %198 : vector<2x32xf32>
    %201 = arith.mulf %190, %165 : vector<2x32xf32>
    %202 = arith.mulf %182, %192 : vector<2x32xf32>
    %203 = arith.addf %201, %202 : vector<2x32xf32>
    %204 = math.tanh %203 : vector<2x32xf32>
    %205 = arith.mulf %200, %204 : vector<2x32xf32>
    %206 = vector.extract_strided_slice %205 {offsets = [0, 0], sizes = [2, 16], strides = [1, 1]} : vector<2x32xf32> to vector<2x16xf32>
    %c8_67 = arith.constant 8 : index
    %c0_68 = arith.constant 0 : index
    %207 = vector.load %arg4[%c8_67, %c0_68] : memref<16x32xf32, #tpu.memory_space<vmem>>, vector<2x16xf32>
    tpu.vector_store %arg4[%c8_67, %c0_68], %206 {strides = array<i32>} : memref<16x32xf32, #tpu.memory_space<vmem>>, vector<2x16xf32>,
    %208 = vector.extract_strided_slice %205 {offsets = [0, 16], sizes = [2, 16], strides = [1, 1]} : vector<2x32xf32> to vector<2x16xf32>
    %c6_69 = arith.constant 6 : index
    %c16_70 = arith.constant 16 : index
    %209 = vector.load %arg4[%c6_69, %c16_70] : memref<16x32xf32, #tpu.memory_space<vmem>>, vector<2x16xf32>
    tpu.vector_store %arg4[%c6_69, %c16_70], %208 {strides = array<i32>} : memref<16x32xf32, #tpu.memory_space<vmem>>, vector<2x16xf32>,
    %210 = vector.extract_strided_slice %16 {offsets = [10, 0], sizes = [2, 128], strides = [1, 1]} : vector<16x128xf32> to vector<2x128xf32>
    %cst_71 = arith.constant dense<0.000000e+00> : vector<2x128xf32>
    %211 = tpu.matmul %205, %17, %cst_71 {dimension_numbers = #tpu.dot_dimension_numbers<[1], [0], [0], [1], [0, 0, 1, 1], [], []>} : vector<2x32xf32>, vector<32x128xf32>, vector<2x128xf32> -> vector<2x128xf32>
    %212 = arith.addf %210, %211 : vector<2x128xf32>
    %213 = vector.extract_strided_slice %212 {offsets = [0, 0], sizes = [2, 32], strides = [1, 1]} : vector<2x128xf32> to vector<2x32xf32>
    %cst_72 = arith.constant 0.000000e+00 : f32
    %214 = vector.broadcast %cst_72 : f32 to vector<2x32xf32>
    %215 = arith.subf %214, %213 : vector<2x32xf32>
    %216 = math.exp %215 : vector<2x32xf32>
    %cst_73 = arith.constant 1.000000e+00 : f32
    %217 = vector.broadcast %cst_73 : f32 to vector<2x32xf32>
    %218 = arith.addf %217, %216 : vector<2x32xf32>
    %cst_74 = arith.constant 1.000000e+00 : f32
    %219 = vector.broadcast %cst_74 : f32 to vector<2x32xf32>
    %220 = arith.divf %219, %218 : vector<2x32xf32>
    %221 = vector.extract_strided_slice %212 {offsets = [0, 32], sizes = [2, 32], strides = [1, 1]} : vector<2x128xf32> to vector<2x32xf32>
    %cst_75 = arith.constant 0.000000e+00 : f32
    %222 = vector.broadcast %cst_75 : f32 to vector<2x32xf32>
    %223 = arith.subf %222, %221 : vector<2x32xf32>
    %224 = math.exp %223 : vector<2x32xf32>
    %cst_76 = arith.constant 1.000000e+00 : f32
    %225 = vector.broadcast %cst_76 : f32 to vector<2x32xf32>
    %226 = arith.addf %225, %224 : vector<2x32xf32>
    %cst_77 = arith.constant 1.000000e+00 : f32
    %227 = vector.broadcast %cst_77 : f32 to vector<2x32xf32>
    %228 = arith.divf %227, %226 : vector<2x32xf32>
    %229 = vector.extract_strided_slice %212 {offsets = [0, 64], sizes = [2, 32], strides = [1, 1]} : vector<2x128xf32> to vector<2x32xf32>
    %230 = math.tanh %229 : vector<2x32xf32>
    %231 = vector.extract_strided_slice %212 {offsets = [0, 96], sizes = [2, 32], strides = [1, 1]} : vector<2x128xf32> to vector<2x32xf32>
    %cst_78 = arith.constant 0.000000e+00 : f32
    %232 = vector.broadcast %cst_78 : f32 to vector<2x32xf32>
    %233 = arith.subf %232, %231 : vector<2x32xf32>
    %234 = math.exp %233 : vector<2x32xf32>
    %cst_79 = arith.constant 1.000000e+00 : f32
    %235 = vector.broadcast %cst_79 : f32 to vector<2x32xf32>
    %236 = arith.addf %235, %234 : vector<2x32xf32>
    %cst_80 = arith.constant 1.000000e+00 : f32
    %237 = vector.broadcast %cst_80 : f32 to vector<2x32xf32>
    %238 = arith.divf %237, %236 : vector<2x32xf32>
    %239 = arith.mulf %228, %203 : vector<2x32xf32>
    %240 = arith.mulf %220, %230 : vector<2x32xf32>
    %241 = arith.addf %239, %240 : vector<2x32xf32>
    %242 = math.tanh %241 : vector<2x32xf32>
    %243 = arith.mulf %238, %242 : vector<2x32xf32>
    %244 = vector.extract_strided_slice %243 {offsets = [0, 0], sizes = [2, 16], strides = [1, 1]} : vector<2x32xf32> to vector<2x16xf32>
    %c10_81 = arith.constant 10 : index
    %c0_82 = arith.constant 0 : index
    %245 = vector.load %arg4[%c10_81, %c0_82] : memref<16x32xf32, #tpu.memory_space<vmem>>, vector<2x16xf32>
    tpu.vector_store %arg4[%c10_81, %c0_82], %244 {strides = array<i32>} : memref<16x32xf32, #tpu.memory_space<vmem>>, vector<2x16xf32>,
    %246 = vector.extract_strided_slice %243 {offsets = [0, 16], sizes = [2, 16], strides = [1, 1]} : vector<2x32xf32> to vector<2x16xf32>
    %c4_83 = arith.constant 4 : index
    %c16_84 = arith.constant 16 : index
    %247 = vector.load %arg4[%c4_83, %c16_84] : memref<16x32xf32, #tpu.memory_space<vmem>>, vector<2x16xf32>
    tpu.vector_store %arg4[%c4_83, %c16_84], %246 {strides = array<i32>} : memref<16x32xf32, #tpu.memory_space<vmem>>, vector<2x16xf32>,
    %248 = vector.extract_strided_slice %16 {offsets = [12, 0], sizes = [2, 128], strides = [1, 1]} : vector<16x128xf32> to vector<2x128xf32>
    %cst_85 = arith.constant dense<0.000000e+00> : vector<2x128xf32>
    %249 = tpu.matmul %243, %17, %cst_85 {dimension_numbers = #tpu.dot_dimension_numbers<[1], [0], [0], [1], [0, 0, 1, 1], [], []>} : vector<2x32xf32>, vector<32x128xf32>, vector<2x128xf32> -> vector<2x128xf32>
    %250 = arith.addf %248, %249 : vector<2x128xf32>
    %251 = vector.extract_strided_slice %250 {offsets = [0, 0], sizes = [2, 32], strides = [1, 1]} : vector<2x128xf32> to vector<2x32xf32>
    %cst_86 = arith.constant 0.000000e+00 : f32
    %252 = vector.broadcast %cst_86 : f32 to vector<2x32xf32>
    %253 = arith.subf %252, %251 : vector<2x32xf32>
    %254 = math.exp %253 : vector<2x32xf32>
    %cst_87 = arith.constant 1.000000e+00 : f32
    %255 = vector.broadcast %cst_87 : f32 to vector<2x32xf32>
    %256 = arith.addf %255, %254 : vector<2x32xf32>
    %cst_88 = arith.constant 1.000000e+00 : f32
    %257 = vector.broadcast %cst_88 : f32 to vector<2x32xf32>
    %258 = arith.divf %257, %256 : vector<2x32xf32>
    %259 = vector.extract_strided_slice %250 {offsets = [0, 32], sizes = [2, 32], strides = [1, 1]} : vector<2x128xf32> to vector<2x32xf32>
    %cst_89 = arith.constant 0.000000e+00 : f32
    %260 = vector.broadcast %cst_89 : f32 to vector<2x32xf32>
    %261 = arith.subf %260, %259 : vector<2x32xf32>
    %262 = math.exp %261 : vector<2x32xf32>
    %cst_90 = arith.constant 1.000000e+00 : f32
    %263 = vector.broadcast %cst_90 : f32 to vector<2x32xf32>
    %264 = arith.addf %263, %262 : vector<2x32xf32>
    %cst_91 = arith.constant 1.000000e+00 : f32
    %265 = vector.broadcast %cst_91 : f32 to vector<2x32xf32>
    %266 = arith.divf %265, %264 : vector<2x32xf32>
    %267 = vector.extract_strided_slice %250 {offsets = [0, 64], sizes = [2, 32], strides = [1, 1]} : vector<2x128xf32> to vector<2x32xf32>
    %268 = math.tanh %267 : vector<2x32xf32>
    %269 = vector.extract_strided_slice %250 {offsets = [0, 96], sizes = [2, 32], strides = [1, 1]} : vector<2x128xf32> to vector<2x32xf32>
    %cst_92 = arith.constant 0.000000e+00 : f32
    %270 = vector.broadcast %cst_92 : f32 to vector<2x32xf32>
    %271 = arith.subf %270, %269 : vector<2x32xf32>
    %272 = math.exp %271 : vector<2x32xf32>
    %cst_93 = arith.constant 1.000000e+00 : f32
    %273 = vector.broadcast %cst_93 : f32 to vector<2x32xf32>
    %274 = arith.addf %273, %272 : vector<2x32xf32>
    %cst_94 = arith.constant 1.000000e+00 : f32
    %275 = vector.broadcast %cst_94 : f32 to vector<2x32xf32>
    %276 = arith.divf %275, %274 : vector<2x32xf32>
    %277 = arith.mulf %266, %241 : vector<2x32xf32>
    %278 = arith.mulf %258, %268 : vector<2x32xf32>
    %279 = arith.addf %277, %278 : vector<2x32xf32>
    %280 = math.tanh %279 : vector<2x32xf32>
    %281 = arith.mulf %276, %280 : vector<2x32xf32>
    %282 = vector.extract_strided_slice %281 {offsets = [0, 0], sizes = [2, 16], strides = [1, 1]} : vector<2x32xf32> to vector<2x16xf32>
    %c12_95 = arith.constant 12 : index
    %c0_96 = arith.constant 0 : index
    %283 = vector.load %arg4[%c12_95, %c0_96] : memref<16x32xf32, #tpu.memory_space<vmem>>, vector<2x16xf32>
    tpu.vector_store %arg4[%c12_95, %c0_96], %282 {strides = array<i32>} : memref<16x32xf32, #tpu.memory_space<vmem>>, vector<2x16xf32>,
    %284 = vector.extract_strided_slice %281 {offsets = [0, 16], sizes = [2, 16], strides = [1, 1]} : vector<2x32xf32> to vector<2x16xf32>
    %c2_97 = arith.constant 2 : index
    %c16_98 = arith.constant 16 : index
    %285 = vector.load %arg4[%c2_97, %c16_98] : memref<16x32xf32, #tpu.memory_space<vmem>>, vector<2x16xf32>
    tpu.vector_store %arg4[%c2_97, %c16_98], %284 {strides = array<i32>} : memref<16x32xf32, #tpu.memory_space<vmem>>, vector<2x16xf32>,
    %286 = vector.extract_strided_slice %16 {offsets = [14, 0], sizes = [2, 128], strides = [1, 1]} : vector<16x128xf32> to vector<2x128xf32>
    %cst_99 = arith.constant dense<0.000000e+00> : vector<2x128xf32>
    %287 = tpu.matmul %281, %17, %cst_99 {dimension_numbers = #tpu.dot_dimension_numbers<[1], [0], [0], [1], [0, 0, 1, 1], [], []>} : vector<2x32xf32>, vector<32x128xf32>, vector<2x128xf32> -> vector<2x128xf32>
    %288 = arith.addf %286, %287 : vector<2x128xf32>
    %289 = vector.extract_strided_slice %288 {offsets = [0, 0], sizes = [2, 32], strides = [1, 1]} : vector<2x128xf32> to vector<2x32xf32>
    %cst_100 = arith.constant 0.000000e+00 : f32
    %290 = vector.broadcast %cst_100 : f32 to vector<2x32xf32>
    %291 = arith.subf %290, %289 : vector<2x32xf32>
    %292 = math.exp %291 : vector<2x32xf32>
    %cst_101 = arith.constant 1.000000e+00 : f32
    %293 = vector.broadcast %cst_101 : f32 to vector<2x32xf32>
    %294 = arith.addf %293, %292 : vector<2x32xf32>
    %cst_102 = arith.constant 1.000000e+00 : f32
    %295 = vector.broadcast %cst_102 : f32 to vector<2x32xf32>
    %296 = arith.divf %295, %294 : vector<2x32xf32>
    %297 = vector.extract_strided_slice %288 {offsets = [0, 32], sizes = [2, 32], strides = [1, 1]} : vector<2x128xf32> to vector<2x32xf32>
    %cst_103 = arith.constant 0.000000e+00 : f32
    %298 = vector.broadcast %cst_103 : f32 to vector<2x32xf32>
    %299 = arith.subf %298, %297 : vector<2x32xf32>
    %300 = math.exp %299 : vector<2x32xf32>
    %cst_104 = arith.constant 1.000000e+00 : f32
    %301 = vector.broadcast %cst_104 : f32 to vector<2x32xf32>
    %302 = arith.addf %301, %300 : vector<2x32xf32>
    %cst_105 = arith.constant 1.000000e+00 : f32
    %303 = vector.broadcast %cst_105 : f32 to vector<2x32xf32>
    %304 = arith.divf %303, %302 : vector<2x32xf32>
    %305 = vector.extract_strided_slice %288 {offsets = [0, 64], sizes = [2, 32], strides = [1, 1]} : vector<2x128xf32> to vector<2x32xf32>
    %306 = math.tanh %305 : vector<2x32xf32>
    %307 = vector.extract_strided_slice %288 {offsets = [0, 96], sizes = [2, 32], strides = [1, 1]} : vector<2x128xf32> to vector<2x32xf32>
    %cst_106 = arith.constant 0.000000e+00 : f32
    %308 = vector.broadcast %cst_106 : f32 to vector<2x32xf32>
    %309 = arith.subf %308, %307 : vector<2x32xf32>
    %310 = math.exp %309 : vector<2x32xf32>
    %cst_107 = arith.constant 1.000000e+00 : f32
    %311 = vector.broadcast %cst_107 : f32 to vector<2x32xf32>
    %312 = arith.addf %311, %310 : vector<2x32xf32>
    %cst_108 = arith.constant 1.000000e+00 : f32
    %313 = vector.broadcast %cst_108 : f32 to vector<2x32xf32>
    %314 = arith.divf %313, %312 : vector<2x32xf32>
    %315 = arith.mulf %304, %279 : vector<2x32xf32>
    %316 = arith.mulf %296, %306 : vector<2x32xf32>
    %317 = arith.addf %315, %316 : vector<2x32xf32>
    %318 = math.tanh %317 : vector<2x32xf32>
    %319 = arith.mulf %314, %318 : vector<2x32xf32>
    %320 = vector.extract_strided_slice %319 {offsets = [0, 0], sizes = [2, 16], strides = [1, 1]} : vector<2x32xf32> to vector<2x16xf32>
    %c14_109 = arith.constant 14 : index
    %c0_110 = arith.constant 0 : index
    %321 = vector.load %arg4[%c14_109, %c0_110] : memref<16x32xf32, #tpu.memory_space<vmem>>, vector<2x16xf32>
    tpu.vector_store %arg4[%c14_109, %c0_110], %320 {strides = array<i32>} : memref<16x32xf32, #tpu.memory_space<vmem>>, vector<2x16xf32>,
    %322 = vector.extract_strided_slice %319 {offsets = [0, 16], sizes = [2, 16], strides = [1, 1]} : vector<2x32xf32> to vector<2x16xf32>
    %c0_111 = arith.constant 0 : index
    %c16_112 = arith.constant 16 : index
    %323 = vector.load %arg4[%c0_111, %c16_112] : memref<16x32xf32, #tpu.memory_space<vmem>>, vector<2x16xf32>
    tpu.vector_store %arg4[%c0_111, %c16_112], %322 {strides = array<i32>} : memref<16x32xf32, #tpu.memory_space<vmem>>, vector<2x16xf32>,
    %c0_113 = arith.constant 0 : index
    %c0_114 = arith.constant 0 : index
    %324 = vector.load %arg4[%c0_113, %c0_114] : memref<16x32xf32, #tpu.memory_space<vmem>>, vector<16x32xf32>
    %cst_115 = arith.constant dense<0.000000e+00> : vector<16xf32>
    %325 = vector.multi_reduction <add>, %324, %cst_115 [1] : vector<16x32xf32> to vector<16xf32>
    %326 = vector.shape_cast %325 : vector<16xf32> to vector<16x1xf32>
    %cst_116 = arith.constant 3.200000e+01 : f32
    %327 = vector.broadcast %cst_116 : f32 to vector<16x1xf32>
    %328 = arith.divf %326, %327 : vector<16x1xf32>
    %329 = vector.broadcast %328 : vector<16x1xf32> to vector<16x32xf32>
    %330 = arith.subf %324, %329 : vector<16x32xf32>
    %331 = arith.mulf %330, %330 : vector<16x32xf32>
    %cst_117 = arith.constant dense<0.000000e+00> : vector<16xf32>
    %332 = vector.multi_reduction <add>, %331, %cst_117 [1] : vector<16x32xf32> to vector<16xf32>
    %333 = vector.shape_cast %332 : vector<16xf32> to vector<16x1xf32>
    %cst_118 = arith.constant 3.200000e+01 : f32
    %334 = vector.broadcast %cst_118 : f32 to vector<16x1xf32>
    %335 = arith.divf %333, %334 : vector<16x1xf32>
    %336 = vector.broadcast %328 : vector<16x1xf32> to vector<16x32xf32>
    %337 = arith.subf %324, %336 : vector<16x32xf32>
    %cst_119 = arith.constant 9.99999974E-6 : f32
    %338 = vector.broadcast %cst_119 : f32 to vector<16x1xf32>
    %339 = arith.addf %335, %338 : vector<16x1xf32>
    %340 = math.rsqrt %339 : vector<16x1xf32>
    %341 = vector.broadcast %340 : vector<16x1xf32> to vector<16x32xf32>
    %342 = arith.mulf %337, %341 : vector<16x32xf32>
    %c2_120 = arith.constant 2 : index
    %c0_121 = arith.constant 0 : index
    %343 = vector.load %arg2[%c2_120, %c0_121] : memref<3x128xf32, #tpu.memory_space<vmem>>, vector<1x32xf32>
    %344 = vector.broadcast %343 : vector<1x32xf32> to vector<16x32xf32>
    %345 = arith.mulf %342, %344 : vector<16x32xf32>
    %c2_122 = arith.constant 2 : index
    %c32 = arith.constant 32 : index
    %346 = vector.load %arg2[%c2_122, %c32] : memref<3x128xf32, #tpu.memory_space<vmem>>, vector<1x32xf32>
    %347 = vector.broadcast %346 : vector<1x32xf32> to vector<16x32xf32>
    %348 = arith.addf %345, %347 : vector<16x32xf32>
    %c96 = arith.constant 96 : index
    %c0_123 = arith.constant 0 : index
    %349 = vector.load %arg1[%c96, %c0_123] : memref<160x128xf32, #tpu.memory_space<vmem>>, vector<32x128xf32>
    %c1_124 = arith.constant 1 : index
    %c0_125 = arith.constant 0 : index
    %350 = vector.load %arg2[%c1_124, %c0_125] : memref<3x128xf32, #tpu.memory_space<vmem>>, vector<1x128xf32>
    %351 = vector.extract_strided_slice %349 {offsets = [0, 0], sizes = [32, 96], strides = [1, 1]} : vector<32x128xf32> to vector<32x96xf32>
    %cst_126 = arith.constant dense<0.000000e+00> : vector<16x96xf32>
    %352 = tpu.matmul %348, %351, %cst_126 {dimension_numbers = #tpu.dot_dimension_numbers<[1], [0], [0], [1], [0, 0, 1, 1], [], []>} : vector<16x32xf32>, vector<32x96xf32>, vector<16x96xf32> -> vector<16x96xf32>
    %353 = vector.extract_strided_slice %350 {offsets = [0, 0], sizes = [1, 96], strides = [1, 1]} : vector<1x128xf32> to vector<1x96xf32>
    %354 = vector.broadcast %353 : vector<1x96xf32> to vector<16x96xf32>
    %355 = arith.addf %352, %354 : vector<16x96xf32>
    %356 = vector.extract_strided_slice %355 {offsets = [0, 0], sizes = [16, 32], strides = [1, 1]} : vector<16x96xf32> to vector<16x32xf32>
    %357 = vector.extract_strided_slice %355 {offsets = [0, 32], sizes = [16, 32], strides = [1, 1]} : vector<16x96xf32> to vector<16x32xf32>
    %358 = vector.extract_strided_slice %355 {offsets = [0, 64], sizes = [16, 32], strides = [1, 1]} : vector<16x96xf32> to vector<16x32xf32>
    %359 = vector.extract_strided_slice %356 {offsets = [0, 0], sizes = [16, 4], strides = [1, 1]} : vector<16x32xf32> to vector<16x4xf32>
    %360 = vector.extract_strided_slice %356 {offsets = [0, 4], sizes = [16, 4], strides = [1, 1]} : vector<16x32xf32> to vector<16x4xf32>
    %361 = vector.extract_strided_slice %356 {offsets = [0, 8], sizes = [16, 4], strides = [1, 1]} : vector<16x32xf32> to vector<16x4xf32>
    %362 = vector.extract_strided_slice %356 {offsets = [0, 12], sizes = [16, 4], strides = [1, 1]} : vector<16x32xf32> to vector<16x4xf32>
    %363 = vector.extract_strided_slice %356 {offsets = [0, 16], sizes = [16, 4], strides = [1, 1]} : vector<16x32xf32> to vector<16x4xf32>
    %364 = vector.extract_strided_slice %356 {offsets = [0, 20], sizes = [16, 4], strides = [1, 1]} : vector<16x32xf32> to vector<16x4xf32>
    %365 = vector.extract_strided_slice %356 {offsets = [0, 24], sizes = [16, 4], strides = [1, 1]} : vector<16x32xf32> to vector<16x4xf32>
    %366 = vector.extract_strided_slice %356 {offsets = [0, 28], sizes = [16, 4], strides = [1, 1]} : vector<16x32xf32> to vector<16x4xf32>
    %367 = vector.shape_cast %359 : vector<16x4xf32> to vector<1x16x4xf32>
    %368 = vector.shape_cast %360 : vector<16x4xf32> to vector<1x16x4xf32>
    %369 = vector.shape_cast %361 : vector<16x4xf32> to vector<1x16x4xf32>
    %370 = vector.shape_cast %362 : vector<16x4xf32> to vector<1x16x4xf32>
    %371 = vector.shape_cast %363 : vector<16x4xf32> to vector<1x16x4xf32>
    %372 = vector.shape_cast %364 : vector<16x4xf32> to vector<1x16x4xf32>
    %373 = vector.shape_cast %365 : vector<16x4xf32> to vector<1x16x4xf32>
    %374 = vector.shape_cast %366 : vector<16x4xf32> to vector<1x16x4xf32>
    %375 = tpu.concatenate %367, %368, %369, %370, %371, %372, %373, %374 in 0 : vector<1x16x4xf32>, vector<1x16x4xf32>, vector<1x16x4xf32>, vector<1x16x4xf32>, vector<1x16x4xf32>, vector<1x16x4xf32>, vector<1x16x4xf32>, vector<1x16x4xf32> -> vector<8x16x4xf32>
    %376 = vector.extract_strided_slice %357 {offsets = [0, 0], sizes = [16, 4], strides = [1, 1]} : vector<16x32xf32> to vector<16x4xf32>
    %377 = vector.extract_strided_slice %357 {offsets = [0, 4], sizes = [16, 4], strides = [1, 1]} : vector<16x32xf32> to vector<16x4xf32>
    %378 = vector.extract_strided_slice %357 {offsets = [0, 8], sizes = [16, 4], strides = [1, 1]} : vector<16x32xf32> to vector<16x4xf32>
    %379 = vector.extract_strided_slice %357 {offsets = [0, 12], sizes = [16, 4], strides = [1, 1]} : vector<16x32xf32> to vector<16x4xf32>
    %380 = vector.extract_strided_slice %357 {offsets = [0, 16], sizes = [16, 4], strides = [1, 1]} : vector<16x32xf32> to vector<16x4xf32>
    %381 = vector.extract_strided_slice %357 {offsets = [0, 20], sizes = [16, 4], strides = [1, 1]} : vector<16x32xf32> to vector<16x4xf32>
    %382 = vector.extract_strided_slice %357 {offsets = [0, 24], sizes = [16, 4], strides = [1, 1]} : vector<16x32xf32> to vector<16x4xf32>
    %383 = vector.extract_strided_slice %357 {offsets = [0, 28], sizes = [16, 4], strides = [1, 1]} : vector<16x32xf32> to vector<16x4xf32>
    %384 = vector.shape_cast %376 : vector<16x4xf32> to vector<1x16x4xf32>
    %385 = vector.shape_cast %377 : vector<16x4xf32> to vector<1x16x4xf32>
    %386 = vector.shape_cast %378 : vector<16x4xf32> to vector<1x16x4xf32>
    %387 = vector.shape_cast %379 : vector<16x4xf32> to vector<1x16x4xf32>
    %388 = vector.shape_cast %380 : vector<16x4xf32> to vector<1x16x4xf32>
    %389 = vector.shape_cast %381 : vector<16x4xf32> to vector<1x16x4xf32>
    %390 = vector.shape_cast %382 : vector<16x4xf32> to vector<1x16x4xf32>
    %391 = vector.shape_cast %383 : vector<16x4xf32> to vector<1x16x4xf32>
    %392 = tpu.concatenate %384, %385, %386, %387, %388, %389, %390, %391 in 0 : vector<1x16x4xf32>, vector<1x16x4xf32>, vector<1x16x4xf32>, vector<1x16x4xf32>, vector<1x16x4xf32>, vector<1x16x4xf32>, vector<1x16x4xf32>, vector<1x16x4xf32> -> vector<8x16x4xf32>
    %393 = vector.extract_strided_slice %358 {offsets = [0, 0], sizes = [16, 4], strides = [1, 1]} : vector<16x32xf32> to vector<16x4xf32>
    %394 = vector.extract_strided_slice %358 {offsets = [0, 4], sizes = [16, 4], strides = [1, 1]} : vector<16x32xf32> to vector<16x4xf32>
    %395 = vector.extract_strided_slice %358 {offsets = [0, 8], sizes = [16, 4], strides = [1, 1]} : vector<16x32xf32> to vector<16x4xf32>
    %396 = vector.extract_strided_slice %358 {offsets = [0, 12], sizes = [16, 4], strides = [1, 1]} : vector<16x32xf32> to vector<16x4xf32>
    %397 = vector.extract_strided_slice %358 {offsets = [0, 16], sizes = [16, 4], strides = [1, 1]} : vector<16x32xf32> to vector<16x4xf32>
    %398 = vector.extract_strided_slice %358 {offsets = [0, 20], sizes = [16, 4], strides = [1, 1]} : vector<16x32xf32> to vector<16x4xf32>
    %399 = vector.extract_strided_slice %358 {offsets = [0, 24], sizes = [16, 4], strides = [1, 1]} : vector<16x32xf32> to vector<16x4xf32>
    %400 = vector.extract_strided_slice %358 {offsets = [0, 28], sizes = [16, 4], strides = [1, 1]} : vector<16x32xf32> to vector<16x4xf32>
    %401 = vector.shape_cast %393 : vector<16x4xf32> to vector<1x16x4xf32>
    %402 = vector.shape_cast %394 : vector<16x4xf32> to vector<1x16x4xf32>
    %403 = vector.shape_cast %395 : vector<16x4xf32> to vector<1x16x4xf32>
    %404 = vector.shape_cast %396 : vector<16x4xf32> to vector<1x16x4xf32>
    %405 = vector.shape_cast %397 : vector<16x4xf32> to vector<1x16x4xf32>
    %406 = vector.shape_cast %398 : vector<16x4xf32> to vector<1x16x4xf32>
    %407 = vector.shape_cast %399 : vector<16x4xf32> to vector<1x16x4xf32>
    %408 = vector.shape_cast %400 : vector<16x4xf32> to vector<1x16x4xf32>
    %409 = tpu.concatenate %401, %402, %403, %404, %405, %406, %407, %408 in 0 : vector<1x16x4xf32>, vector<1x16x4xf32>, vector<1x16x4xf32>, vector<1x16x4xf32>, vector<1x16x4xf32>, vector<1x16x4xf32>, vector<1x16x4xf32>, vector<1x16x4xf32> -> vector<8x16x4xf32>
    %410 = tpu.iota {dimensions = array<i32: 0>} : vector<16x16xi32>
    %411 = tpu.iota {dimensions = array<i32: 1>} : vector<16x16xi32>
    %c1_i32 = arith.constant 1 : i32
    %412 = vector.broadcast %c1_i32 : i32 to vector<16x16xi32>
    %413 = arith.andi %410, %412 : vector<16x16xi32>
    %c1_i32_127 = arith.constant 1 : i32
    %414 = vector.broadcast %c1_i32_127 : i32 to vector<16x16xi32>
    %415 = arith.andi %411, %414 : vector<16x16xi32>
    %416 = arith.cmpi eq, %413, %415 : vector<16x16xi32>
    %cst_128 = arith.constant 0.000000e+00 : f32
    %cst_129 = arith.constant -1.000000e+30 : f32
    %417 = vector.broadcast %cst_128 : f32 to vector<16x16xf32>
    %418 = vector.broadcast %cst_129 : f32 to vector<16x16xf32>
    %419 = arith.select %416, %417, %418 : vector<16x16xi1>, vector<16x16xf32>
    "tpu.trace_start"() <{level = 10 : i32, message = "hsd,htd->hst"}> : () -> ()
    %cst_130 = arith.constant dense<0.000000e+00> : vector<8x16x16xf32>
    %420 = tpu.matmul %375, %392, %cst_130 {dimension_numbers = #tpu.dot_dimension_numbers<[2], [2], [1], [1], [0, 0, 0, 1, 1, 1], [0], [0]>} : vector<8x16x4xf32>, vector<8x16x4xf32>, vector<8x16x16xf32> -> vector<8x16x16xf32>
    "tpu.trace_stop"() : () -> ()
    %421 = vector.shape_cast %419 : vector<16x16xf32> to vector<1x16x16xf32>
    %422 = vector.broadcast %421 : vector<1x16x16xf32> to vector<8x16x16xf32>
    %423 = arith.addf %420, %422 : vector<8x16x16xf32>
    %cst_131 = arith.constant dense<0xFF800000> : vector<8x16xf32>
    %424 = vector.multi_reduction <maximumf>, %423, %cst_131 [2] : vector<8x16x16xf32> to vector<8x16xf32>
    %425 = vector.shape_cast %424 : vector<8x16xf32> to vector<8x16x1xf32>
    %426 = vector.broadcast %425 : vector<8x16x1xf32> to vector<8x16x16xf32>
    %427 = arith.subf %423, %426 : vector<8x16x16xf32>
    %428 = math.exp %427 : vector<8x16x16xf32>
    %cst_132 = arith.constant dense<0.000000e+00> : vector<8x16xf32>
    %429 = vector.multi_reduction <add>, %428, %cst_132 [2] : vector<8x16x16xf32> to vector<8x16xf32>
    %430 = vector.shape_cast %429 : vector<8x16xf32> to vector<8x16x1xf32>
    %431 = tpu.reciprocal %430 {approx = true} : vector<8x16x1xf32> -> vector<8x16x1xf32>
    %432 = vector.broadcast %431 : vector<8x16x1xf32> to vector<8x16x16xf32>
    %433 = arith.mulf %428, %432 : vector<8x16x16xf32>
    "tpu.trace_start"() <{level = 10 : i32, message = "hst,htd->hsd"}> : () -> ()
    %cst_133 = arith.constant dense<0.000000e+00> : vector<8x16x4xf32>
    %434 = tpu.matmul %433, %409, %cst_133 {dimension_numbers = #tpu.dot_dimension_numbers<[2], [1], [1], [2], [0, 0, 0, 1, 1, 2], [0], [0]>} : vector<8x16x16xf32>, vector<8x16x4xf32>, vector<8x16x4xf32> -> vector<8x16x4xf32>
    "tpu.trace_stop"() : () -> ()
    %435 = vector.extract_strided_slice %434 {offsets = [0, 0, 0], sizes = [1, 16, 4], strides = [1, 1, 1]} : vector<8x16x4xf32> to vector<1x16x4xf32>
    %436 = vector.shape_cast %435 : vector<1x16x4xf32> to vector<16x4xf32>
    %437 = vector.extract_strided_slice %434 {offsets = [1, 0, 0], sizes = [1, 16, 4], strides = [1, 1, 1]} : vector<8x16x4xf32> to vector<1x16x4xf32>
    %438 = vector.shape_cast %437 : vector<1x16x4xf32> to vector<16x4xf32>
    %439 = vector.extract_strided_slice %434 {offsets = [2, 0, 0], sizes = [1, 16, 4], strides = [1, 1, 1]} : vector<8x16x4xf32> to vector<1x16x4xf32>
    %440 = vector.shape_cast %439 : vector<1x16x4xf32> to vector<16x4xf32>
    %441 = vector.extract_strided_slice %434 {offsets = [3, 0, 0], sizes = [1, 16, 4], strides = [1, 1, 1]} : vector<8x16x4xf32> to vector<1x16x4xf32>
    %442 = vector.shape_cast %441 : vector<1x16x4xf32> to vector<16x4xf32>
    %443 = vector.extract_strided_slice %434 {offsets = [4, 0, 0], sizes = [1, 16, 4], strides = [1, 1, 1]} : vector<8x16x4xf32> to vector<1x16x4xf32>
    %444 = vector.shape_cast %443 : vector<1x16x4xf32> to vector<16x4xf32>
    %445 = vector.extract_strided_slice %434 {offsets = [5, 0, 0], sizes = [1, 16, 4], strides = [1, 1, 1]} : vector<8x16x4xf32> to vector<1x16x4xf32>
    %446 = vector.shape_cast %445 : vector<1x16x4xf32> to vector<16x4xf32>
    %447 = vector.extract_strided_slice %434 {offsets = [6, 0, 0], sizes = [1, 16, 4], strides = [1, 1, 1]} : vector<8x16x4xf32> to vector<1x16x4xf32>
    %448 = vector.shape_cast %447 : vector<1x16x4xf32> to vector<16x4xf32>
    %449 = vector.extract_strided_slice %434 {offsets = [7, 0, 0], sizes = [1, 16, 4], strides = [1, 1, 1]} : vector<8x16x4xf32> to vector<1x16x4xf32>
    %450 = vector.shape_cast %449 : vector<1x16x4xf32> to vector<16x4xf32>
    %451 = tpu.concatenate %436, %438, %440, %442, %444, %446, %448, %450 in 1 : vector<16x4xf32>, vector<16x4xf32>, vector<16x4xf32>, vector<16x4xf32>, vector<16x4xf32>, vector<16x4xf32>, vector<16x4xf32>, vector<16x4xf32> -> vector<16x32xf32>
    %452 = vector.extract_strided_slice %349 {offsets = [0, 96], sizes = [32, 32], strides = [1, 1]} : vector<32x128xf32> to vector<32x32xf32>
    %cst_134 = arith.constant dense<0.000000e+00> : vector<16x32xf32>
    %453 = tpu.matmul %451, %452, %cst_134 {dimension_numbers = #tpu.dot_dimension_numbers<[1], [0], [0], [1], [0, 0, 1, 1], [], []>} : vector<16x32xf32>, vector<32x32xf32>, vector<16x32xf32> -> vector<16x32xf32>
    %454 = vector.extract_strided_slice %350 {offsets = [0, 96], sizes = [1, 32], strides = [1, 1]} : vector<1x128xf32> to vector<1x32xf32>
    %455 = vector.broadcast %454 : vector<1x32xf32> to vector<16x32xf32>
    %456 = arith.addf %453, %455 : vector<16x32xf32>
    %c128 = arith.constant 128 : index
    %c0_135 = arith.constant 0 : index
    %457 = vector.load %arg1[%c128, %c0_135] : memref<160x128xf32, #tpu.memory_space<vmem>>, vector<32x128xf32>
    %458 = vector.extract_strided_slice %457 {offsets = [0, 0], sizes = [32, 16], strides = [1, 1]} : vector<32x128xf32> to vector<32x16xf32>
    %459 = vector.extract_strided_slice %457 {offsets = [0, 16], sizes = [32, 16], strides = [1, 1]} : vector<32x128xf32> to vector<32x16xf32>
    %460 = vector.extract_strided_slice %457 {offsets = [0, 32], sizes = [32, 16], strides = [1, 1]} : vector<32x128xf32> to vector<32x16xf32>
    %461 = tpu.iota {dimensions = array<i32: 0>} : vector<2x16xi32>
    %462 = tpu.iota {dimensions = array<i32: 1>} : vector<2x16xi32>
    %c1_i32_136 = arith.constant 1 : i32
    %463 = vector.broadcast %c1_i32_136 : i32 to vector<2x16xi32>
    %464 = arith.andi %462, %463 : vector<2x16xi32>
    %465 = arith.cmpi eq, %464, %461 : vector<2x16xi32>
    %466 = arith.extui %465 : vector<2x16xi1> to vector<2x16xi32>
    %467 = arith.sitofp %466 : vector<2x16xi32> to vector<2x16xf32>
    %cst_137 = arith.constant dense<0.000000e+00> : vector<2x32xf32>
    %468 = tpu.matmul %467, %456, %cst_137 {dimension_numbers = #tpu.dot_dimension_numbers<[1], [0], [0], [1], [0, 0, 1, 1], [], []>} : vector<2x16xf32>, vector<16x32xf32>, vector<2x32xf32> -> vector<2x32xf32>
    %469 = vector.extract_strided_slice %456 {offsets = [0, 0], sizes = [2, 32], strides = [1, 1]} : vector<16x32xf32> to vector<2x32xf32>
    %470 = vector.extract_strided_slice %456 {offsets = [14, 0], sizes = [2, 32], strides = [1, 1]} : vector<16x32xf32> to vector<2x32xf32>
    %cst_138 = arith.constant dense<0.000000e+00> : vector<2x16xf32>
    %471 = tpu.matmul %468, %458, %cst_138 {dimension_numbers = #tpu.dot_dimension_numbers<[1], [0], [0], [1], [0, 0, 1, 1], [], []>} : vector<2x32xf32>, vector<32x16xf32>, vector<2x16xf32> -> vector<2x16xf32>
    %cst_139 = arith.constant dense<0.000000e+00> : vector<2x16xf32>
    %472 = tpu.matmul %470, %459, %cst_139 {dimension_numbers = #tpu.dot_dimension_numbers<[1], [0], [0], [1], [0, 0, 1, 1], [], []>} : vector<2x32xf32>, vector<32x16xf32>, vector<2x16xf32> -> vector<2x16xf32>
    %473 = arith.subf %471, %472 : vector<2x16xf32>
    %cst_140 = arith.constant dense<0.000000e+00> : vector<2x16xf32>
    %474 = tpu.matmul %469, %460, %cst_140 {dimension_numbers = #tpu.dot_dimension_numbers<[1], [0], [0], [1], [0, 0, 1, 1], [], []>} : vector<2x32xf32>, vector<32x16xf32>, vector<2x16xf32> -> vector<2x16xf32>
    %475 = arith.subf %473, %474 : vector<2x16xf32>
    %c2_141 = arith.constant 2 : index
    %c64_142 = arith.constant 64 : index
    %476 = vector.load %arg2[%c2_141, %c64_142] : memref<3x128xf32, #tpu.memory_space<vmem>>, vector<1x16xf32>
    %477 = vector.broadcast %476 : vector<1x16xf32> to vector<2x16xf32>
    %478 = arith.addf %475, %477 : vector<2x16xf32>
    %479 = vector.extract_strided_slice %457 {offsets = [0, 48], sizes = [16, 8], strides = [1, 1]} : vector<32x128xf32> to vector<16x8xf32>
    %480 = vector.extract_strided_slice %457 {offsets = [0, 56], sizes = [8, 1], strides = [1, 1]} : vector<32x128xf32> to vector<8x1xf32>
    %c2_143 = arith.constant 2 : index
    %c80 = arith.constant 80 : index
    %481 = vector.load %arg2[%c2_143, %c80] : memref<3x128xf32, #tpu.memory_space<vmem>>, vector<1x8xf32>
    %c2_144 = arith.constant 2 : index
    %c88 = arith.constant 88 : index
    %482 = vector.load %arg2[%c2_144, %c88] : memref<3x128xf32, #tpu.memory_space<vmem>>, vector<1x1xf32>
    %cst_145 = arith.constant dense<0.000000e+00> : vector<2x8xf32>
    %483 = tpu.matmul %478, %479, %cst_145 {dimension_numbers = #tpu.dot_dimension_numbers<[1], [0], [0], [1], [0, 0, 1, 1], [], []>} : vector<2x16xf32>, vector<16x8xf32>, vector<2x8xf32> -> vector<2x8xf32>
    %484 = vector.broadcast %481 : vector<1x8xf32> to vector<2x8xf32>
    %485 = arith.addf %483, %484 : vector<2x8xf32>
    %cst_146 = arith.constant 0.000000e+00 : f32
    %486 = vector.broadcast %cst_146 : f32 to vector<2x8xf32>
    %487 = arith.maximumf %485, %486 : vector<2x8xf32>
    %cst_147 = arith.constant dense<0.000000e+00> : vector<2x1xf32>
    %488 = tpu.matmul %487, %480, %cst_147 {dimension_numbers = #tpu.dot_dimension_numbers<[1], [0], [0], [1], [0, 0, 1, 1], [], []>} : vector<2x8xf32>, vector<8x1xf32>, vector<2x1xf32> -> vector<2x1xf32>
    %489 = vector.broadcast %482 : vector<1x1xf32> to vector<2x1xf32>
    %490 = arith.addf %488, %489 : vector<2x1xf32>
    %cst_148 = arith.constant 0.000000e+00 : f32
    %491 = vector.broadcast %cst_148 : f32 to vector<2x1xf32>
    %492 = arith.subf %491, %490 : vector<2x1xf32>
    %493 = math.exp %492 : vector<2x1xf32>
    %cst_149 = arith.constant 1.000000e+00 : f32
    %494 = vector.broadcast %cst_149 : f32 to vector<2x1xf32>
    %495 = arith.addf %494, %493 : vector<2x1xf32>
    %cst_150 = arith.constant 1.000000e+00 : f32
    %496 = vector.broadcast %cst_150 : f32 to vector<2x1xf32>
    %497 = arith.divf %496, %495 : vector<2x1xf32>
    %c0_151 = arith.constant 0 : index
    %c0_152 = arith.constant 0 : index
    %498 = vector.load %arg3[%c0_151, %c0_152] : memref<2x1xf32, #tpu.memory_space<vmem>>, vector<2x1xf32>
    tpu.vector_store %arg3[%c0_151, %c0_152], %497 {strides = array<i32>} : memref<2x1xf32, #tpu.memory_space<vmem>>, vector<2x1xf32>,
    return
  }
}

</mosaic_0001>

<bundles_post_ra>
// kernel: extractive_summarizer.1
= control target key start
LH: loop header
LB: loop body
LE: loop exit
PB: predicated region body
PF: predicated region fallthrough
CT: control target
= control target key end

     0   :  { %8 = vsyncpa [#allocation4], 0  ;;  %s4183_s12 = smov [#allocation3]   ;;  %s4923_s0 = inlined_call_operand.vmem [shape: s32[16,2], index: 0, kind: input, shape index: {}]   ;;  %s4924_s1 = inlined_call_operand.hbm [shape: f32[160,128], index: 1, kind: input, shape index: {}]   ;;  %s4925_s2 = inlined_call_operand.vmem [shape: f32[3,128], index: 2, kind: input, shape index: {}]   ;;  %s4926_s3 = inlined_call_operand.vmem [shape: f32[2,1], index: 3, kind: output, shape index: {}]  }
   0x1   :  { %s16_s13 = sshll.u32 %s4183_s12, 4  ;;  %s17_s13 = int_to_ptr.vmem [resolvable:$true] %s16_s13 }
   0x2   :  { %s4169_s14 = scalar_lea.vmem %s17_s13, 2560  ;;  %p4174_p1 = scmp.lt.s32.totalorder %s17_s13, %s17_s13 }
   0x3   :  { %p4170_p0 = scmp.ne.s32.totalorder %s17_s13, %s4169_s14  ;;  %p4175_p2 = scmp.lt.s32.totalorder %s4169_s14, %s4169_s14 }
   0x5   :  { %p4176_p3 = por %p4175_p2, %p4174_p1 }
   0x7   :  { %p4177_p4 = pnand %p4176_p3, %p4170_p0 }
   0x9   :  { %4180 = shalt.err (!%p4177_p4)
}
   0xa   :  { %s4184_s15 = smov 128   ;;  %s4185_s16 = smov 8  }
   0xb   :  { %22 = dma.hbm_to_vmem [thread:$0]  %s4924_s1, 2560, %s17_s13, [#allocation4], %s4184_s15, %s4184_s15, %s4185_s16  }
   0xc   :  { %4181 = dma.done.wait [#allocation4], 2560  }
   0xd   :  { %4182 = vsyncadd [#allocation4], 4294964736  ;;  %v4186_v0 = vmov 0   ;;  %v4187_v1 = vmov 0.0   ;;  %v31_v2 = vld [vmem:[%s4923_s0 + $0x8] sm:$0xff]  ;;  %v30_v3 = vld [vmem:[%s4923_s0] sm:$0xff]  ;;  %v28_v19 = vlaneseq }
   0xe   :  { %4022 = vset.pattern.permute.xlu1 %v4186_v0  ;;  %4020 = vset.pattern.permute.xlu0 %v4186_v0  ;;  %v63_v4 = vld [vmem:[#allocation3 + $0x38] sm:$0xff]  ;;  %v62_v5 = vld [vmem:[#allocation3 + $0x30] sm:$0xff]  ;;  %v41_v6 = vadd.s32 32, %v31_v2  ;;  %v40_v7 = vadd.s32 32, %v30_v3  ;;  %v4188_v10 = vmov 1   ;;  %v61_v11 = vld [vmem:[#allocation3 + $0x28] sm:$0xff] }
   0xf   :  { %3718 = vmatprep.subr.mxu1 %v4187_v1  ;;  %36 = vperm.xlu1 %4022, %v31_v2   ;;  %v4242_v8 = vld [vmem:[#allocation3 + $0x58] sm:$0xff]  ;;  %v4246_v9 = vld [vmem:[#allocation3 + $0x50] sm:$0xff]  ;;  %v4248_v12 = vld [vmem:[#allocation3 + $0x48] sm:$0xff]  ;;  %vm4189_vm0 = vmmov 0   ;;  %v4273_v22 = vand.u32 127, %v28_v19  ;;  %vm69_vm6 = vcmask 523264  }
  0x10   :  { %33 = vperm.xlu0 %4020, %v30_v3   ;;  %3699 = vmatprep.subr.mxu0 %v63_v4  ;;  %v60_v13 = vld [vmem:[#allocation3 + $0x20] sm:$0xff]  ;;  %v59_v15 = vld [vmem:[#allocation3 + $0x18] sm:$0xff]  ;;  %v58_v16 = vld [vmem:[#allocation3 + $0x10] sm:$0xff]  ;;  %s4190_s23 = smov 64   ;;  %s4191_s24 = smov 32   ;;  %vm258_vm8 = vcmask 123904  }
  0x11   :  { %3700 = vmatpush3.msra.mxu0 %v63_v4  ;;  %3719 = vmatpush3.msra.mxu1 %v4242_v8  ;;  %v4252_v14 = vld [vmem:[#allocation3 + $0x40] sm:$0xff]  ;;  %v57_v17 = vld [vmem:[#allocation3 + $0x8] sm:$0xff]  ;;  %v3478_v29 = vld [vmem:[%s4925_s2] ss:$0 sm:$0xff]  ;;  %vm260_vm9 = vcmask 255104   ;;  %vm155_vm10 = vcmask 261120  }
  0x12   :  { %3701 = vmatprep.subr.mxu0 %v62_v5  ;;  %3720 = vmatprep.subr.mxu1 %v4187_v1  ;;  %v56_v18 = vld [vmem:[#allocation3] sm:$0xff]  ;;  %vm369_vm11 = vcmask 125954   ;;  %vm371_vm12 = vcmask 257154   ;;  %vm597_vm13 = vcmask 130054   ;;  %vm599_vm14 = vcmask 261254   ;;  %s4192_s27 = smov 96  }
  0x13   :  { %4023 = vset.pattern.permute.xlu1 %v4188_v10  ;;  %3702 = vmatpush3.msra.mxu0 %v62_v5  ;;  %vm483_vm15 = vcmask 128004   ;;  %s4193_s30 = smov 124   ;;  %s4194_s4 = smov 116  }
  0x14   :  { %4021 = vset.pattern.permute.xlu0 %v4188_v10  ;;  %46 = vperm.xlu1 %4023, %v41_v6   ;;  %s4195_s5 = smov 120   ;;  %s4196_s6 = smov 108  }
  0x15   :  { %43 = vperm.xlu0 %4021, %v40_v7   ;;  %3721 = vmatpush3.msra.mxu1 %v4246_v9  ;;  %s4197_s7 = smov 112   ;;  %s4198_s8 = smov 100  }
  0x16   :  { %3703 = vmatprep.subr.mxu0 %v61_v11  ;;  %3722 = vmatprep.subr.mxu1 %v4187_v1  ;;  %s4199_s9 = smov 104   ;;  %s4201_s10 = smov 4  }
  0x17   :  { %3704 = vmatpush3.msra.mxu0 %v61_v11  ;;  %3723 = vmatpush3.msra.mxu1 %v4248_v12  ;;  %s4202_s11 = smov 12   ;;  %s4203_s12 = smov 16  }
  0x18   :  { %3705 = vmatprep.subr.mxu0 %v60_v13  ;;  %3724 = vmatprep.subr.mxu1 %v4187_v1  ;;  %s4204_s13 = smov 20   ;;  %s4205_s14 = smov 24  }
  0x19   :  { %3706 = vmatpush3.msra.mxu0 %v60_v13  ;;  %3725 = vmatpush3.msra.mxu1 %v4252_v14  ;;  %s4206_s15 = smov 28   ;;  %s4207_s18 = smov 80  }
  0x1a   :  { %3707 = vmatprep.subr.mxu0 %v59_v15  ;;  %3726 = vmatprep.mubr.msk.f32.mxu1 %vm4189_vm0, %v4187_v1  ;;  %s4209_s19 = smov 72   ;;  %s4210_s20 = smov 40  }
  0x1b   :  { %3708 = vmatpush3.msra.mxu0 %v59_v15  ;;  %3727 = vmatmul.mubr.f32.vlgmr.msra.gmra.mxu1 %v4187_v1 }
  0x1c   :  { %3709 = vmatprep.subr.mxu0 %v58_v16  ;;  %3729 = vmatprep.subr.mxu1 %v4187_v1 }
  0x1d   :  { %3710 = vmatpush3.msra.mxu0 %v58_v16  ;;  %3730 = vmatpush3.msra.mxu1 %v4242_v8 }
  0x1e   :  { %3711 = vmatprep.subr.mxu0 %v57_v17  ;;  %3731 = vmatprep.subr.mxu1 %v4187_v1 }
  0x1f   :  { %3712 = vmatpush3.msra.mxu0 %v57_v17  ;;  %3732 = vmatpush3.msra.mxu1 %v4246_v9 }
  0x20   :  { %3713 = vmatprep.subr.mxu0 %v56_v18  ;;  %3733 = vmatprep.subr.mxu1 %v4187_v1 }
  0x21   :  { %3714 = vmatpush3.msra.mxu0 %v56_v18  ;;  %3734 = vmatpush3.msra.mxu1 %v4248_v12 }
  0x22   :  { %3735 = vmatprep.subr.mxu1 %v4187_v1  ;;  %3737 = vmatprep.mubr.msk.f32.mxu1 %vm4189_vm0, %v4187_v1 }
  0x23   :  { %3736 = vmatpush3.msra.mxu1 %v4252_v14  ;;  %3740 = vmatprep.subr.mxu0 %v4187_v1 }
  0x24   :  { %3751 = vmatprep.subr.mxu1 %v4187_v1 }
  0x8a   :  { %v37_v21 = vpop.permute.xlu1 %36 }
  0x8b   :  { %v34_v20 = vpop.permute.xlu0 %33  ;;  %vm39_vm1 = vcmp.eq.s32.totalorder %v4273_v22, %v37_v21 }
  0x8c   :  { %vm38_vm4 = vcmp.eq.s32.totalorder %v4273_v22, %v34_v20 }
  0x8f   :  { %v47_v23 = vpop.permute.xlu1 %46 }
  0x90   :  { %v44_v24 = vpop.permute.xlu0 %43  ;;  %vm49_vm2 = vcmp.eq.s32.totalorder %v4273_v22, %v47_v23 }
  0x91   :  { %vm48_vm3 = vcmp.eq.s32.totalorder %v4273_v22, %v44_v24  ;;  %vm51_vm5 = vmor %vm39_vm1, %vm49_vm2  ;;  %vm485_vm1 = vcmask 259204   ;;  %vm1219_vm2 = vcmask 31744  }
  0x92   :  { %vm50_vm7 = vmor %vm38_vm4, %vm48_vm3  ;;  %v3477_v25 = vsel %vm51_vm5, 1.0, %v4187_v1  ;;  %vm1912_vm5 = vcmask 130048  }
  0x93   :  { %v3476_v26 = vsel %vm50_vm7, 1.0, %v4187_v1  ;;  %vm2846_vm7 = vcmask 97280  }
  0x94   :  { %3715 = vmatprep.mubr.msk.f32.mxu0 %vm69_vm6, %v3476_v26 }
  0x95   :  { %3716 = vmatmul.mubr.msk.f32.vlgmr.msra.gmra.mxu0 %vm69_vm6, %v3477_v25  ;;  %vm2843_vm6 = vcmask 64512  }
  0x96   :  { %3741 = vmatpush3.msra.mxu0 %v4242_v8  ;;  %3748 = vmatprep.mubr.msk.f32.mxu0 %vm4189_vm0, %v4187_v1 }
  0x97   :  { %3742 = vmatprep.subr.mxu0 %v4187_v1 }
  0x98   :  { %3743 = vmatpush3.msra.mxu0 %v4246_v9 }
  0x99   :  { %3744 = vmatprep.subr.mxu0 %v4187_v1 }
  0x9a   :  { %3745 = vmatpush3.msra.mxu0 %v4248_v12 }
  0x9b   :  { %3746 = vmatprep.subr.mxu0 %v4187_v1 }
  0x9c   :  { %3747 = vmatpush3.msra.mxu0 %v4252_v14 }
  0x9d   :  { %3762 = vmatprep.subr.mxu0 %v4187_v1 }
  0xdb   :  { %v225_v27 = vpop.f32.mrf.mxu1 }
  0xdd   :  { %v3728_v28 = vpop.f32.mrf.mxu1 }
 0x155   :  { %v3717_v30 = vpop.f32.mrf.mxu0 }
 0x156   :  { %v4294_v31 = vadd.f32 %v3717_v30, %v3478_v29 }
 0x157   :  { %v142_v32 = vpop.f32.mrf.mxu0 }
 0x158   :  { %v4296_v33 = vadd.f32 %v3478_v29, %v142_v32 }
 0x15a   :  { %v229_v34 = vadd.f32 %v225_v27, %v4296_v33 }
 0x15c   :  { %4024 = vtanh.f32 %v229_v34  ;;  %v230_v36 = vsub.f32 0.0, %v229_v34 }
 0x15e   :  { %v231_v37 = vmul.f32 1.442695, %v230_v36 }
 0x160   :  { %4026 = vpow2.f32 %v231_v37 }
 0x169   :  { %v4025_v35 = vpop.eup %4024 }
 0x16a   :  { %239 = vrot.lane.b32.xlu1 %v4025_v35, %s4190_s23 }
 0x16d   :  { %v4027_v38 = vpop.eup %4026 }
 0x16e   :  { %v233_v39 = vadd.f32 1.0, %v4027_v38 }
 0x170   :  { %4028 = vrcp.f32 %v233_v39 }
 0x17d   :  { %v4029_v40 = vpop.eup %4028 }
 0x17e   :  { %v237_v43 = vmul.f32 0.0, %v4029_v40 }
 0x1dc   :  { %v240_v41 = vpop.permute.xlu1 %239 }
 0x1dd   :  { %v242_v42 = vmul.f32 %v4029_v40, %v240_v41 }
 0x1df   :  { %244 = vrot.lane.b32.xlu0 %v242_v42, %s4191_s24 }
 0x251   :  { %v245_v44 = vpop.permute.xlu0 %244 }
 0x252   :  { %v247_v45 = vadd.f32 %v245_v44, %v237_v43 }
 0x254   :  { %4030 = vtanh.f32 %v247_v45  ;;  %v346_v62 = vrot.slane %v247_v45, 6 }
 0x261   :  { %v4031_v46 = vpop.eup %4030 }
 0x262   :  { %250 = vrot.lane.b32.xlu1 %v4031_v46, %s4190_s23 }
 0x2d4   :  { %v251_v47 = vpop.permute.xlu1 %250 }
 0x2d5   :  { %v253_v48 = vmul.f32 %v4029_v40, %v251_v47 }
 0x2d7   :  { %255 = vrot.lane.b32.xlu0 %v253_v48, %s4191_s24 }
 0x349   :  { %v256_v49 = vpop.permute.xlu0 %255 }
 0x34a   :  { %259 = vst.msk [vmem:[#allocation2] sm:$0x3] %vm258_vm8, %v256_v49  ;;  %3738 = vmatmul.mubr.msk.f32.vlgmr.msra.gmra.mxu1 %vm155_vm10, %v256_v49 }
 0x34b   :  { %261 = vst.msk [vmem:[#allocation2 + $0xe] sm:$0x3] %vm260_vm9, %v256_v49  ;;  %3752 = vmatpush3.msra.mxu1 %v4242_v8  ;;  %3759 = vmatprep.mubr.msk.f32.mxu1 %vm4189_vm0, %v4187_v1 }
 0x34c   :  { %3753 = vmatprep.subr.mxu1 %v4187_v1 }
 0x34d   :  { %3754 = vmatpush3.msra.mxu1 %v4246_v9 }
 0x34e   :  { %3755 = vmatprep.subr.mxu1 %v4187_v1 }
 0x34f   :  { %3756 = vmatpush3.msra.mxu1 %v4248_v12 }
 0x350   :  { %3757 = vmatprep.subr.mxu1 %v4187_v1 }
 0x351   :  { %3758 = vmatpush3.msra.mxu1 %v4252_v14 }
 0x352   :  { %3773 = vmatprep.subr.mxu1 %v4187_v1 }
 0x40a   :  { %v330_v50 = vpop.f32.mrf.mxu1 }
 0x40b   :  { %v335_v51 = vrot.slane %v330_v50, 6 }
 0x40c   :  { %v3739_v52 = vpop.f32.mrf.mxu1 }
 0x40d   :  { %v337_v53 = vadd.f32 %v335_v51, %v4296_v33 }
 0x40f   :  { %4032 = vtanh.f32 %v337_v53  ;;  %v338_v55 = vsub.f32 0.0, %v337_v53 }
 0x411   :  { %v339_v56 = vmul.f32 1.442695, %v338_v55 }
 0x413   :  { %4034 = vpow2.f32 %v339_v56 }
 0x41c   :  { %v4033_v54 = vpop.eup %4032 }
 0x41d   :  { %350 = vrot.lane.b32.xlu1 %v4033_v54, %s4190_s23 }
 0x420   :  { %v4035_v57 = vpop.eup %4034 }
 0x421   :  { %v341_v58 = vadd.f32 1.0, %v4035_v57 }
 0x423   :  { %4036 = vrcp.f32 %v341_v58 }
 0x430   :  { %v4037_v59 = vpop.eup %4036 }
 0x431   :  { %v348_v63 = vmul.f32 %v4037_v59, %v346_v62 }
 0x48f   :  { %v351_v60 = vpop.permute.xlu1 %350 }
 0x490   :  { %v353_v61 = vmul.f32 %v4037_v59, %v351_v60 }
 0x492   :  { %355 = vrot.lane.b32.xlu0 %v353_v61, %s4191_s24 }
 0x504   :  { %v356_v0 = vpop.permute.xlu0 %355 }
 0x505   :  { %v358_v2 = vadd.f32 %v356_v0, %v348_v63 }
 0x507   :  { %4038 = vtanh.f32 %v358_v2  ;;  %v460_v26 = vrot.slane %v358_v2, 6 }
 0x514   :  { %v4039_v3 = vpop.eup %4038 }
 0x515   :  { %361 = vrot.lane.b32.xlu1 %v4039_v3, %s4190_s23 }
 0x587   :  { %v362_v4 = vpop.permute.xlu1 %361 }
 0x588   :  { %v4320_v5 = vmul.f32 %v4037_v59, %v362_v4 }
 0x58a   :  { %v373_v6 = vrot.slane %v4320_v5, 2 }
 0x58c   :  { %374 = vrot.lane.b32.xlu0 %v373_v6, %s4191_s24 }
 0x5fe   :  { %v375_v7 = vpop.permute.xlu0 %374 }
 0x5ff   :  { %3749 = vmatmul.mubr.msk.f32.vlgmr.msra.gmra.mxu0 %vm155_vm10, %v375_v7 }
 0x600   :  { %3763 = vmatpush3.msra.mxu0 %v4242_v8  ;;  %3770 = vmatprep.mubr.msk.f32.mxu0 %vm4189_vm0, %v4187_v1 }
 0x601   :  { %3764 = vmatprep.subr.mxu0 %v4187_v1 }
 0x602   :  { %3765 = vmatpush3.msra.mxu0 %v4246_v9 }
 0x603   :  { %3766 = vmatprep.subr.mxu0 %v4187_v1 }
 0x604   :  { %3767 = vmatpush3.msra.mxu0 %v4248_v12 }
 0x605   :  { %3768 = vmatprep.subr.mxu0 %v4187_v1 }
 0x606   :  { %3769 = vmatpush3.msra.mxu0 %v4252_v14 }
 0x607   :  { %3784 = vmatprep.subr.mxu0 %v4187_v1 }
 0x6bf   :  { %v444_v10 = vpop.f32.mrf.mxu0 }
 0x6c0   :  { %v449_v11 = vrot.slane %v444_v10, 4 }
 0x6c1   :  { %v3750_v13 = vpop.f32.mrf.mxu0 }
 0x6c2   :  { %v451_v15 = vadd.f32 %v449_v11, %v4296_v33 }
 0x6c4   :  { %4040 = vtanh.f32 %v451_v15  ;;  %v452_v17 = vsub.f32 0.0, %v451_v15 }
 0x6c6   :  { %v453_v18 = vmul.f32 1.442695, %v452_v17 }
 0x6c8   :  { %4042 = vpow2.f32 %v453_v18 }
 0x6d1   :  { %v4041_v16 = vpop.eup %4040 }
 0x6d2   :  { %464 = vrot.lane.b32.xlu1 %v4041_v16, %s4190_s23 }
 0x6d5   :  { %v4043_v20 = vpop.eup %4042 }
 0x6d6   :  { %v455_v21 = vadd.f32 1.0, %v4043_v20 }
 0x6d8   :  { %4044 = vrcp.f32 %v455_v21 }
 0x6e5   :  { %v4045_v23 = vpop.eup %4044 }
 0x6e6   :  { %v462_v27 = vmul.f32 %v4045_v23, %v460_v26 }
 0x744   :  { %v465_v24 = vpop.permute.xlu1 %464 }
 0x745   :  { %v467_v25 = vmul.f32 %v4045_v23, %v465_v24 }
 0x747   :  { %469 = vrot.lane.b32.xlu0 %v467_v25, %s4191_s24 }
 0x7b9   :  { %v470_v28 = vpop.permute.xlu0 %469 }
 0x7ba   :  { %v472_v29 = vadd.f32 %v470_v28, %v462_v27 }
 0x7bc   :  { %4046 = vtanh.f32 %v472_v29  ;;  %v574_v49 = vrot.slane %v472_v29, 6 }
 0x7c9   :  { %v4047_v30 = vpop.eup %4046 }
 0x7ca   :  { %475 = vrot.lane.b32.xlu1 %v4047_v30, %s4190_s23 }
 0x83c   :  { %v476_v32 = vpop.permute.xlu1 %475 }
 0x83d   :  { %v4339_v34 = vmul.f32 %v4045_v23, %v476_v32 }
 0x83f   :  { %v487_v35 = vrot.slane %v4339_v34, 4 }
 0x841   :  { %488 = vrot.lane.b32.xlu0 %v487_v35, %s4191_s24 }
 0x8b3   :  { %v489_v36 = vpop.permute.xlu0 %488 }
 0x8b4   :  { %3760 = vmatmul.mubr.msk.f32.vlgmr.msra.gmra.mxu1 %vm155_vm10, %v489_v36 }
 0x8b5   :  { %3774 = vmatpush3.msra.mxu1 %v4242_v8  ;;  %3781 = vmatprep.mubr.msk.f32.mxu1 %vm4189_vm0, %v4187_v1 }
 0x8b6   :  { %3775 = vmatprep.subr.mxu1 %v4187_v1 }
 0x8b7   :  { %3776 = vmatpush3.msra.mxu1 %v4246_v9 }
 0x8b8   :  { %3777 = vmatprep.subr.mxu1 %v4187_v1 }
 0x8b9   :  { %3778 = vmatpush3.msra.mxu1 %v4248_v12 }
 0x8ba   :  { %3779 = vmatprep.subr.mxu1 %v4187_v1 }
 0x8bb   :  { %3780 = vmatpush3.msra.mxu1 %v4252_v14 }
 0x8bc   :  { %3795 = vmatprep.subr.mxu1 %v4187_v1 }
 0x974   :  { %v558_v37 = vpop.f32.mrf.mxu1 }
 0x975   :  { %v563_v38 = vrot.slane %v558_v37, 2 }
 0x976   :  { %v3761_v39 = vpop.f32.mrf.mxu1 }
 0x977   :  { %v565_v40 = vadd.f32 %v563_v38, %v4296_v33 }
 0x979   :  { %4048 = vtanh.f32 %v565_v40  ;;  %v566_v42 = vsub.f32 0.0, %v565_v40 }
 0x97b   :  { %v567_v43 = vmul.f32 1.442695, %v566_v42 }
 0x97d   :  { %4050 = vpow2.f32 %v567_v43 }
 0x986   :  { %v4049_v41 = vpop.eup %4048 }
 0x987   :  { %578 = vrot.lane.b32.xlu1 %v4049_v41, %s4190_s23 }
 0x98a   :  { %v4051_v44 = vpop.eup %4050 }
 0x98b   :  { %v569_v45 = vadd.f32 1.0, %v4051_v44 }
 0x98d   :  { %4052 = vrcp.f32 %v569_v45 }
 0x99a   :  { %v4053_v46 = vpop.eup %4052 }
 0x99b   :  { %v576_v50 = vmul.f32 %v4053_v46, %v574_v49 }
 0x9f9   :  { %v579_v47 = vpop.permute.xlu1 %578 }
 0x9fa   :  { %v581_v48 = vmul.f32 %v4053_v46, %v579_v47 }
 0x9fc   :  { %583 = vrot.lane.b32.xlu0 %v581_v48, %s4191_s24 }
 0xa6e   :  { %v584_v51 = vpop.permute.xlu0 %583 }
 0xa6f   :  { %v586_v52 = vadd.f32 %v584_v51, %v576_v50 }
 0xa71   :  { %4054 = vtanh.f32 %v586_v52  ;;  %v685_v6 = vrot.slane %v586_v52, 6 }
 0xa7e   :  { %v4055_v33 = vpop.eup %4054 }
 0xa7f   :  { %589 = vrot.lane.b32.xlu1 %v4055_v33, %s4190_s23 }
 0xaf1   :  { %v590_v53 = vpop.permute.xlu1 %589 }
 0xaf2   :  { %v4358_v54 = vmul.f32 %v4053_v46, %v590_v53 }
 0xaf4   :  { %v601_v55 = vrot.slane %v4358_v54, 6 }
 0xaf6   :  { %602 = vrot.lane.b32.xlu0 %v601_v55, %s4191_s24 }
 0xb68   :  { %v603_v56 = vpop.permute.xlu0 %602 }
 0xb69   :  { %3771 = vmatmul.mubr.msk.f32.vlgmr.msra.gmra.mxu0 %vm155_vm10, %v603_v56 }
 0xb6a   :  { %3785 = vmatpush3.msra.mxu0 %v4242_v8  ;;  %3792 = vmatprep.mubr.msk.f32.mxu0 %vm4189_vm0, %v4187_v1 }
 0xb6b   :  { %3786 = vmatprep.subr.mxu0 %v4187_v1 }
 0xb6c   :  { %3787 = vmatpush3.msra.mxu0 %v4246_v9 }
 0xb6d   :  { %3788 = vmatprep.subr.mxu0 %v4187_v1 }
 0xb6e   :  { %3789 = vmatpush3.msra.mxu0 %v4248_v12 }
 0xb6f   :  { %3790 = vmatprep.subr.mxu0 %v4187_v1 }
 0xb70   :  { %3791 = vmatpush3.msra.mxu0 %v4252_v14 }
 0xc29   :  { %v672_v57 = vpop.f32.mrf.mxu0 }
 0xc2a   :  { %v676_v58 = vadd.f32 %v672_v57, %v4294_v31 }
 0xc2b   :  { %v3772_v59 = vpop.f32.mrf.mxu0 }
 0xc2c   :  { %4056 = vtanh.f32 %v676_v58  ;;  %v677_v61 = vsub.f32 0.0, %v676_v58 }
 0xc2e   :  { %v678_v62 = vmul.f32 1.442695, %v677_v61 }
 0xc30   :  { %4058 = vpow2.f32 %v678_v62 }
 0xc39   :  { %v4057_v60 = vpop.eup %4056 }
 0xc3a   :  { %689 = vrot.lane.b32.xlu1 %v4057_v60, %s4190_s23 }
 0xc3d   :  { %v4059_v63 = vpop.eup %4058 }
 0xc3e   :  { %v680_v0 = vadd.f32 1.0, %v4059_v63 }
 0xc40   :  { %4060 = vrcp.f32 %v680_v0 }
 0xc4d   :  { %v4061_v2 = vpop.eup %4060 }
 0xc4e   :  { %v687_v7 = vmul.f32 %v4061_v2, %v685_v6 }
 0xcac   :  { %v690_v3 = vpop.permute.xlu1 %689 }
 0xcad   :  { %v692_v4 = vmul.f32 %v4061_v2, %v690_v3 }
 0xcaf   :  { %694 = vrot.lane.b32.xlu0 %v692_v4, %s4191_s24 }
 0xd21   :  { %v695_v10 = vpop.permute.xlu0 %694 }
 0xd22   :  { %v697_v11 = vadd.f32 %v695_v10, %v687_v7 }
 0xd24   :  { %4062 = vtanh.f32 %v697_v11 }
 0xd31   :  { %v4063_v13 = vpop.eup %4062 }
 0xd32   :  { %700 = vrot.lane.b32.xlu1 %v4063_v13, %s4190_s23 }
 0xda4   :  { %v701_v15 = vpop.permute.xlu1 %700 }
 0xda5   :  { %v703_v16 = vmul.f32 %v4061_v2, %v701_v15 }
 0xda7   :  { %705 = vrot.lane.b32.xlu0 %v703_v16, %s4191_s24 }
 0xe19   :  { %v4377_v17 = vpop.permute.xlu0 %705 }
 0xe1a   :  { %3782 = vmatmul.mubr.msk.f32.vlgmr.msra.gmra.mxu1 %vm155_vm10, %v4377_v17 }
 0xe1b   :  { %3796 = vmatpush3.msra.mxu1 %v4242_v8  ;;  %3803 = vmatprep.mubr.msk.f32.mxu1 %vm4189_vm0, %v4187_v1 }
 0xe1c   :  { %3797 = vmatprep.subr.mxu1 %v4187_v1 }
 0xe1d   :  { %3798 = vmatpush3.msra.mxu1 %v4246_v9 }
 0xe1e   :  { %3799 = vmatprep.subr.mxu1 %v4187_v1 }
 0xe1f   :  { %3800 = vmatpush3.msra.mxu1 %v4248_v12 }
 0xe20   :  { %3801 = vmatprep.subr.mxu1 %v4187_v1 }
 0xe21   :  { %3802 = vmatpush3.msra.mxu1 %v4252_v14  ;;  %v794_v14 = vrot.slane %v697_v11, 6 }
 0xeda   :  { %v778_v18 = vpop.f32.mrf.mxu1 }
 0xedb   :  { %v783_v20 = vrot.slane %v778_v18, 6 }
 0xedc   :  { %v3783_v21 = vpop.f32.mrf.mxu1 }
 0xedd   :  { %v785_v8 = vadd.f32 %v783_v20, %v4294_v31 }
 0xedf   :  { %4064 = vtanh.f32 %v785_v8  ;;  %v786_v24 = vsub.f32 0.0, %v785_v8 }
 0xee1   :  { %v787_v25 = vmul.f32 1.442695, %v786_v24 }
 0xee3   :  { %4066 = vpow2.f32 %v787_v25 }
 0xeec   :  { %v4065_v23 = vpop.eup %4064 }
 0xeed   :  { %798 = vrot.lane.b32.xlu1 %v4065_v23, %s4190_s23 }
 0xef0   :  { %v4067_v9 = vpop.eup %4066 }
 0xef1   :  { %v789_v26 = vadd.f32 1.0, %v4067_v9 }
 0xef3   :  { %4068 = vrcp.f32 %v789_v26 }
 0xf00   :  { %v4069_v12 = vpop.eup %4068 }
 0xf01   :  { %v796_v29 = vmul.f32 %v4069_v12, %v794_v14 }
 0xf5f   :  { %v799_v27 = vpop.permute.xlu1 %798 }
 0xf60   :  { %v801_v28 = vmul.f32 %v4069_v12, %v799_v27  ;;  %v3488_v27 = vld [vmem:[%s4925_s2 + $0x2] ss:$0 sm:$0xff] }
 0xf62   :  { %803 = vrot.lane.b32.xlu0 %v801_v28, %s4191_s24 }
 0xfd4   :  { %v804_v30 = vpop.permute.xlu0 %803 }
 0xfd5   :  { %v806_v32 = vadd.f32 %v804_v30, %v796_v29 }
 0xfd7   :  { %4070 = vtanh.f32 %v806_v32  ;;  %v906_v52 = vrot.slane %v806_v32, 6 }
 0xfe4   :  { %v4071_v35 = vpop.eup %4070 }
 0xfe5   :  { %809 = vrot.lane.b32.xlu1 %v4071_v35, %s4190_s23 }
0x1057   :  { %v810_v36 = vpop.permute.xlu1 %809 }
0x1058   :  { %v4394_v37 = vmul.f32 %v4069_v12, %v810_v36 }
0x105a   :  { %v819_v38 = vrot.slane %v4394_v37, 2 }
0x105c   :  { %820 = vrot.lane.b32.xlu0 %v819_v38, %s4191_s24 }
0x10ce   :  { %v821_v39 = vpop.permute.xlu0 %820 }
0x10cf   :  { %3793 = vmatmul.mubr.msk.f32.vlgmr.msra.gmra.mxu0 %vm155_vm10, %v821_v39 }
0x118f   :  { %v890_v40 = vpop.f32.mrf.mxu0 }
0x1190   :  { %v895_v41 = vrot.slane %v890_v40, 4  ;;  %v4439_v40 = vld [vmem:[#allocation3 + $0x78] sm:$0xff] }
0x1191   :  { %v3794_v42 = vpop.f32.mrf.mxu0  ;;  %3806 = vmatprep.subr.mxu0 %v4439_v40 }
0x1192   :  { %v897_v43 = vadd.f32 %v895_v41, %v4294_v31  ;;  %3807 = vmatpush3.msra.mxu0 %v4439_v40  ;;  %v4443_v41 = vld [vmem:[#allocation3 + $0x70] sm:$0xff]  ;;  %v4447_v42 = vld [vmem:[#allocation3 + $0x68] sm:$0xff] }
0x1193   :  { %3808 = vmatprep.subr.mxu0 %v4443_v41 }
0x1194   :  { %4072 = vtanh.f32 %v897_v43  ;;  %v898_v45 = vsub.f32 0.0, %v897_v43  ;;  %3809 = vmatpush3.msra.mxu0 %v4443_v41  ;;  %v1085_v43 = vld [vmem:[#allocation3 + $0x60] sm:$0xff] }
0x1195   :  { %3810 = vmatprep.subr.mxu0 %v4447_v42 }
0x1196   :  { %v899_v46 = vmul.f32 1.442695, %v898_v45  ;;  %3811 = vmatpush3.msra.mxu0 %v4447_v42 }
0x1197   :  { %3812 = vmatprep.subr.mxu0 %v1085_v43 }
0x1198   :  { %4074 = vpow2.f32 %v899_v46  ;;  %3813 = vmatpush3.msra.mxu0 %v1085_v43 }
0x11a1   :  { %v4073_v44 = vpop.eup %4072 }
0x11a2   :  { %910 = vrot.lane.b32.xlu1 %v4073_v44, %s4190_s23 }
0x11a5   :  { %v4075_v47 = vpop.eup %4074 }
0x11a6   :  { %v901_v48 = vadd.f32 1.0, %v4075_v47 }
0x11a8   :  { %4076 = vrcp.f32 %v901_v48 }
0x11b5   :  { %v4077_v49 = vpop.eup %4076 }
0x11b6   :  { %v908_v33 = vmul.f32 %v4077_v49, %v906_v52 }
0x1214   :  { %v911_v50 = vpop.permute.xlu1 %910 }
0x1215   :  { %v913_v51 = vmul.f32 %v4077_v49, %v911_v50 }
0x1217   :  { %915 = vrot.lane.b32.xlu0 %v913_v51, %s4191_s24 }
0x1289   :  { %v916_v53 = vpop.permute.xlu0 %915 }
0x128a   :  { %v918_v55 = vadd.f32 %v916_v53, %v908_v33 }
0x128c   :  { %4078 = vtanh.f32 %v918_v55 }
0x1299   :  { %v4079_v56 = vpop.eup %4078 }
0x129a   :  { %921 = vrot.lane.b32.xlu1 %v4079_v56, %s4190_s23 }
0x130c   :  { %v922_v57 = vpop.permute.xlu1 %921 }
0x130d   :  { %v924_v58 = vmul.f32 %v4077_v49, %v922_v57 }
0x130f   :  { %v931_v59 = vrot.slane %v924_v58, 4 }
0x1311   :  { %932 = vrot.lane.b32.xlu0 %v931_v59, %s4191_s24  ;;  %v4456_v59 = vld [vmem:[%s4925_s2 + $0x1] ss:$0 sm:$0xff] }
0x1383   :  { %v933_v60 = vpop.permute.xlu0 %932 }
0x1384   :  { %3804 = vmatmul.mubr.msk.f32.vlgmr.msra.gmra.mxu1 %vm155_vm10, %v933_v60 }
0x1444   :  { %v1002_v61 = vpop.f32.mrf.mxu1 }
0x1445   :  { %v1007_v62 = vrot.slane %v1002_v61, 2 }
0x1446   :  { %v3805_v63 = vpop.f32.mrf.mxu1 }
0x1447   :  { %v1009_v0 = vadd.f32 %v1007_v62, %v4294_v31  ;;  %v1018_v31 = vrot.slane %v918_v55, 6 }
0x1449   :  { %4080 = vtanh.f32 %v1009_v0  ;;  %v1010_v3 = vsub.f32 0.0, %v1009_v0 }
0x144b   :  { %v1011_v4 = vmul.f32 1.442695, %v1010_v3 }
0x144d   :  { %4082 = vpow2.f32 %v1011_v4 }
0x1456   :  { %v4081_v2 = vpop.eup %4080 }
0x1457   :  { %1022 = vrot.lane.b32.xlu1 %v4081_v2, %s4190_s23 }
0x145a   :  { %v4083_v6 = vpop.eup %4082 }
0x145b   :  { %v1013_v7 = vadd.f32 1.0, %v4083_v6 }
0x145d   :  { %4084 = vrcp.f32 %v1013_v7 }
0x146a   :  { %v4085_v10 = vpop.eup %4084 }
0x146b   :  { %v1020_v15 = vmul.f32 %v4085_v10, %v1018_v31 }
0x14c9   :  { %v1023_v11 = vpop.permute.xlu1 %1022 }
0x14ca   :  { %v1025_v13 = vmul.f32 %v4085_v10, %v1023_v11 }
0x14cc   :  { %1027 = vrot.lane.b32.xlu0 %v1025_v13, %s4191_s24 }
0x14d0   :  { %366 = vrot.lane.b32.xlu0 %v4320_v5, %s4191_s24 }
0x14d4   :  { %594 = vrot.lane.b32.xlu0 %v4358_v54, %s4191_s24 }
0x14d8   :  { %926 = vrot.lane.b32.xlu0 %v924_v58, %s4191_s24 }
0x153e   :  { %v1028_v16 = vpop.permute.xlu0 %1027 }
0x153f   :  { %v1030_v18 = vadd.f32 %v1028_v16, %v1020_v15 }
0x1541   :  { %4086 = vtanh.f32 %v1030_v18 }
0x1542   :  { %v367_v20 = vpop.permute.xlu0 %366 }
0x1543   :  { %370 = vst.msk [vmem:[#allocation2] sm:$0xc] %vm369_vm11, %v367_v20 }
0x1544   :  { %372 = vst.msk [vmem:[#allocation2 + $0xa] sm:$0xc] %vm371_vm12, %v367_v20 }
0x1546   :  { %v595_v5 = vpop.permute.xlu0 %594 }
0x1547   :  { %598 = vst.msk [vmem:[#allocation2] sm:$0xc0] %vm597_vm13, %v595_v5 }
0x1548   :  { %600 = vst.msk [vmem:[#allocation2 + $0x2] sm:$0xc0] %vm599_vm14, %v595_v5 }
0x1549   :  { %708 = vst.msk [vmem:[#allocation2 + $0x8] sm:$0x3] %vm258_vm8, %v4377_v17  ;;  %vm2851_vm8 = vcmask 162816  }
0x154a   :  { %709 = vst.msk [vmem:[#allocation2 + $0x6] sm:$0x3] %vm260_vm9, %v4377_v17  ;;  %v927_v54 = vpop.permute.xlu0 %926  ;;  %vm2857_vm9 = vcmask 228352  }
0x154b   :  { %929 = vst.msk [vmem:[#allocation2 + $0x8] sm:$0x30] %vm483_vm15, %v927_v54 }
0x154c   :  { %930 = vst.msk [vmem:[#allocation2 - $0x2] sm:$0x30] %vm485_vm1, %v927_v54 }
0x154e   :  { %v4087_v21 = vpop.eup %4086 }
0x154f   :  { %1033 = vrot.lane.b32.xlu1 %v4087_v21, %s4190_s23 }
0x1553   :  { %480 = vrot.lane.b32.xlu1 %v4339_v34, %s4191_s24 }
0x1557   :  { %814 = vrot.lane.b32.xlu1 %v4394_v37, %s4191_s24 }
0x15c1   :  { %v1034_v8 = vpop.permute.xlu1 %1033 }
0x15c2   :  { %v1036_v23 = vmul.f32 %v4085_v10, %v1034_v8 }
0x15c4   :  { %1038 = vrot.lane.b32.xlu1 %v1036_v23, %s4191_s24 }
0x15c5   :  { %v481_v24 = vpop.permute.xlu1 %480 }
0x15c6   :  { %484 = vst.msk [vmem:[#allocation2] sm:$0x30] %vm483_vm15, %v481_v24 }
0x15c7   :  { %486 = vst.msk [vmem:[#allocation2 + $0x6] sm:$0x30] %vm485_vm1, %v481_v24 }
0x15c9   :  { %v815_v17 = vpop.permute.xlu1 %814 }
0x15ca   :  { %817 = vst.msk [vmem:[#allocation2 + $0x8] sm:$0xc] %vm369_vm11, %v815_v17  ;;  %vm2854_vm11 = vcmask 195584  }
0x15cb   :  { %818 = vst.msk [vmem:[#allocation2 + $0x2] sm:$0xc] %vm371_vm12, %v815_v17 }
0x1636   :  { %v1039_v25 = vpop.permute.xlu1 %1038 }
0x1637   :  { %1041 = vst.msk [vmem:[#allocation2 + $0x8] sm:$0xc0] %vm597_vm13, %v1039_v25 }
0x1638   :  { %1042 = vst.msk [vmem:[#allocation2 - $0x6] sm:$0xc0] %vm599_vm14, %v1039_v25 }
0x163e   :  { %v1044_v34 = vld [vmem:[#allocation2 + $0x8] sm:$0xff] }
0x163f   :  { %v1043_v9 = vld [vmem:[#allocation2] sm:$0xff]  ;;  %v1048_v26 = vsel %vm155_vm10, %v1044_v34, 0.0 }
0x1640   :  { %v1045_v12 = vsel %vm155_vm10, %v1043_v9, 0.0  ;;  %1049 = vadd.xlane.f32.xlu1 %v1048_v26 }
0x1641   :  { %1046 = vadd.xlane.f32.xlu0 %v1045_v12 }
0x1651   :  { %1080 = vrot.lane.b32.xlu1 %v3488_v27, %s4192_s27 }
0x16c9   :  { %v1050_v28 = vpop.xlane.xlu1 %1049 }
0x16ca   :  { %v1047_v14 = vpop.xlane.xlu0 %1046  ;;  %v1053_v29 = vmul.f32 0.03125, %v1050_v28 }
0x16cb   :  { %v1052_v30 = vmul.f32 0.03125, %v1047_v14 }
0x16cc   :  { %v1055_v32 = vsub.f32 %v1044_v34, %v1053_v29 }
0x16cd   :  { %v1054_v35 = vsub.f32 %v1043_v9, %v1052_v30  ;;  %v1081_v52 = vpop.permute.xlu1 %1080 }
0x16ce   :  { %v1057_v38 = vmul.f32 %v1055_v32, %v1055_v32 }
0x16cf   :  { %v1056_v36 = vmul.f32 %v1054_v35, %v1054_v35 }
0x16d0   :  { %v1061_v39 = vsel %vm155_vm10, %v1057_v38, 0.0 }
0x16d1   :  { %v1058_v37 = vsel %vm155_vm10, %v1056_v36, 0.0 }
0x16d2   :  { %1059 = vadd.xlane.f32.xlu0 %v1058_v37 }
0x16d6   :  { %1062 = vadd.xlane.f32.xlu0 %v1061_v39  ;;  %v4596_v39 = vshrl.u32 %v28_v19, 7 }
0x16d8   :  { %v1207_v43 = vadd.s32 8, %v4596_v39 }
0x175b   :  { %v1060_v44 = vpop.xlane.xlu0 %1059 }
0x175c   :  { %v1064_v45 = vmul.f32 0.03125, %v1060_v44  ;;  %v1209_v44 = vand.u32 1, %v1207_v43 }
0x175e   :  { %v1066_v46 = vadd.f32 1e-05, %v1064_v45  ;;  %v4600_v45 = vand.u32 1, %v4273_v22 }
0x175f   :  { %v1063_v47 = vpop.xlane.xlu0 %1062 }
0x1760   :  { %4088 = vrsqrt.f32 %v1066_v46  ;;  %v1065_v48 = vmul.f32 0.03125, %v1063_v47  ;;  %v1208_v46 = vand.u32 1, %v4596_v39  ;;  %vm1212_vm3 = vcmp.eq.s32.totalorder %v1209_v44, %v4600_v45 }
0x1761   :  { %v4200_v47 = vmov -1e+30   ;;  %vm2965_vm12 = vcmp.eq.s32.totalorder %v4600_v45, %v4596_v39  ;;  %v3547_v39 = vld [vmem:[%s4925_s2 + $0x2] ss:$0 sm:$0xff]  ;;  %s4208_s2 = smov 48  }
0x1762   :  { %v1067_v49 = vadd.f32 1e-05, %v1065_v48  ;;  %vm1211_vm4 = vcmp.eq.s32.totalorder %v1208_v46, %v4600_v45  ;;  %v1214_v48 = vsel %vm1212_vm3, 0.0, %v4200_v47 }
0x1764   :  { %4090 = vrsqrt.f32 %v1067_v49 }
0x176d   :  { %v4089_v50 = vpop.eup %4088 }
0x176e   :  { %v1070_v51 = vmul.f32 %v4089_v50, %v1054_v35  ;;  %v1213_v50 = vsel %vm1211_vm4, 0.0, %v4200_v47 }
0x1770   :  { %v1077_v33 = vmul.f32 %v3488_v27, %v1070_v51 }
0x1771   :  { %v4091_v53 = vpop.eup %4090 }
0x1772   :  { %v1071_v55 = vmul.f32 %v4091_v53, %v1055_v32  ;;  %v1083_v56 = vadd.f32 %v1081_v52, %v1077_v33 }
0x1774   :  { %v1078_v57 = vmul.f32 %v3488_v27, %v1071_v55  ;;  %3814 = vmatprep.mubr.msk.f32.mxu0 %vm155_vm10, %v1083_v56 }
0x1776   :  { %v1084_v58 = vadd.f32 %v1081_v52, %v1078_v57 }
0x1778   :  { %3815 = vmatmul.mubr.msk.f32.vlgmr.msra.gmra.mxu0 %vm155_vm10, %v1084_v58 }
0x1838   :  { %v3816_v60 = vpop.f32.mrf.mxu0 }
0x1839   :  { %v4459_v61 = vadd.f32 %v3816_v60, %v4456_v59 }
0x183a   :  { %v1166_v62 = vpop.f32.mrf.mxu0 }
0x183b   :  { %v1167_v63 = vadd.f32 %v4456_v59, %v1166_v62  ;;  %1179 = vrot.lane.b32.xlu0 %v4459_v61, %s4193_s30 }
0x183d   :  { %1177 = vrot.lane.b32.xlu1 %v1167_v63, %s4193_s30  ;;  %3821 = vmatprep.mubr.msk.f32.mxu1 %vm1219_vm2, %v1167_v63 }
0x183f   :  { %1187 = vrot.lane.b32.xlu0 %v4459_v61, %s4194_s4 }
0x1841   :  { %1183 = vrot.lane.b32.xlu1 %v4459_v61, %s4195_s5 }
0x1843   :  { %1185 = vrot.lane.b32.xlu0 %v1167_v63, %s4194_s4 }
0x1845   :  { %1181 = vrot.lane.b32.xlu1 %v1167_v63, %s4195_s5 }
0x1847   :  { %1195 = vrot.lane.b32.xlu0 %v4459_v61, %s4196_s6 }
0x1849   :  { %1191 = vrot.lane.b32.xlu1 %v4459_v61, %s4197_s7 }
0x184b   :  { %1193 = vrot.lane.b32.xlu0 %v1167_v63, %s4196_s6 }
0x184d   :  { %1189 = vrot.lane.b32.xlu1 %v1167_v63, %s4197_s7 }
0x184f   :  { %1203 = vrot.lane.b32.xlu0 %v4459_v61, %s4198_s8 }
0x1851   :  { %1199 = vrot.lane.b32.xlu1 %v4459_v61, %s4199_s9 }
0x1853   :  { %1201 = vrot.lane.b32.xlu0 %v1167_v63, %s4198_s8 }
0x1855   :  { %1197 = vrot.lane.b32.xlu1 %v1167_v63, %s4199_s9 }
0x1859   :  { %1217 = vrot.lane.b32.xlu1 %v4459_v61, %s4192_s27 }
0x185d   :  { %1215 = vrot.lane.b32.xlu1 %v1167_v63, %s4192_s27 }
0x18ad   :  { %v1180_v0 = vpop.permute.xlu0 %1179 }
0x18ae   :  { %1305 = vrot.lane.b32.xlu0 %v1180_v0, %s4192_s27 }
0x18af   :  { %v1178_v2 = vpop.permute.xlu1 %1177 }
0x18b0   :  { %3828 = vmatprep.mubr.msk.f32.mxu0 %vm1219_vm2, %v1178_v2 }
0x18b1   :  { %v4477_v3 = vpop.permute.xlu0 %1187 }
0x18b2   :  { %1303 = vrot.lane.b32.xlu0 %v1178_v2, %s4192_s27 }
0x18b3   :  { %v4480_v4 = vpop.permute.xlu1 %1183 }
0x18b4   :  { %1392 = vrot.lane.b32.xlu1 %v4480_v4, %s4192_s27 }
0x18b5   :  { %v1186_v6 = vpop.permute.xlu0 %1185 }
0x18b6   :  { %1479 = vrot.lane.b32.xlu0 %v4477_v3, %s4192_s27 }
0x18b7   :  { %v1182_v7 = vpop.permute.xlu1 %1181 }
0x18b8   :  { %1390 = vrot.lane.b32.xlu1 %v1182_v7, %s4192_s27 }
0x18b9   :  { %v4487_v10 = vpop.permute.xlu0 %1195 }
0x18ba   :  { %1477 = vrot.lane.b32.xlu0 %v1186_v6, %s4192_s27 }
0x18bb   :  { %v4490_v11 = vpop.permute.xlu1 %1191 }
0x18bc   :  { %1566 = vrot.lane.b32.xlu1 %v4490_v11, %s4192_s27 }
0x18bd   :  { %v4494_v13 = vpop.permute.xlu0 %1193 }
0x18be   :  { %1653 = vrot.lane.b32.xlu0 %v4487_v10, %s4192_s27 }
0x18bf   :  { %v1190_v31 = vpop.permute.xlu1 %1189 }
0x18c0   :  { %1564 = vrot.lane.b32.xlu1 %v1190_v31, %s4192_s27 }
0x18c1   :  { %v4501_v15 = vpop.permute.xlu0 %1203 }
0x18c2   :  { %1651 = vrot.lane.b32.xlu0 %v4494_v13, %s4192_s27 }
0x18c3   :  { %v4503_v16 = vpop.permute.xlu1 %1199 }
0x18c4   :  { %1740 = vrot.lane.b32.xlu1 %v4503_v16, %s4192_s27 }
0x18c5   :  { %v4513_v20 = vpop.permute.xlu0 %1201 }
0x18c6   :  { %1827 = vrot.lane.b32.xlu0 %v4501_v15, %s4192_s27 }
0x18c7   :  { %v4509_v18 = vpop.permute.xlu1 %1197 }
0x18c8   :  { %1738 = vrot.lane.b32.xlu1 %v4509_v18, %s4192_s27 }
0x18ca   :  { %1825 = vrot.lane.b32.xlu0 %v4513_v20, %s4192_s27 }
0x18cb   :  { %v1218_v5 = vpop.permute.xlu1 %1217 }
0x18cc   :  { %2089 = vrot.lane.b32.xlu1 %v1167_v63, %s4190_s23  ;;  %3817 = vmatprep.subr.msk.mxu1 %vm1219_vm2, %v1218_v5 }
0x18cd   :  { %3818 = vmatpush3.xpose.msk.msra.mxu1 %vm1219_vm2, %v1218_v5 }
0x18ce   :  { %2091 = vrot.lane.b32.xlu0 %v4459_v61, %s4190_s23 }
0x18cf   :  { %v1216_v54 = vpop.permute.xlu1 %1215 }
0x18d0   :  { %2178 = vrot.lane.b32.xlu1 %v1180_v0, %s4190_s23  ;;  %3819 = vmatprep.subr.msk.mxu1 %vm1219_vm2, %v1216_v54 }
0x18d1   :  { %3820 = vmatpush3.xpose.msk.msra.mxu1 %vm1219_vm2, %v1216_v54 }
0x18d2   :  { %2352 = vrot.lane.b32.xlu0 %v4477_v3, %s4190_s23 }
0x18d4   :  { %2265 = vrot.lane.b32.xlu1 %v4480_v4, %s4190_s23  ;;  %3822 = vmatmul.mubr.msk.f32.vlgmr.msra.gmra.mxu1 %vm1219_vm2, %v4459_v61 }
0x18d5   :  { %3835 = vmatprep.mubr.msk.f32.mxu1 %vm1219_vm2, %v1182_v7 }
0x18d6   :  { %2526 = vrot.lane.b32.xlu0 %v4487_v10, %s4190_s23 }
0x18d8   :  { %2439 = vrot.lane.b32.xlu1 %v4490_v11, %s4190_s23 }
0x18da   :  { %2176 = vrot.lane.b32.xlu0 %v1178_v2, %s4190_s23 }
0x18dc   :  { %2263 = vrot.lane.b32.xlu1 %v1182_v7, %s4190_s23 }
0x18de   :  { %2350 = vrot.lane.b32.xlu0 %v1186_v6, %s4190_s23 }
0x18e0   :  { %2437 = vrot.lane.b32.xlu1 %v1190_v31, %s4190_s23 }
0x1920   :  { %v1306_v21 = vpop.permute.xlu0 %1305 }
0x1921   :  { %3824 = vmatprep.subr.msk.mxu0 %vm1219_vm2, %v1306_v21 }
0x1922   :  { %3825 = vmatpush3.xpose.msk.msra.mxu0 %vm1219_vm2, %v1306_v21 }
0x1924   :  { %v1304_v8 = vpop.permute.xlu0 %1303 }
0x1925   :  { %3826 = vmatprep.subr.msk.mxu0 %vm1219_vm2, %v1304_v8 }
0x1926   :  { %3827 = vmatpush3.xpose.msk.msra.mxu0 %vm1219_vm2, %v1304_v8  ;;  %v1393_v23 = vpop.permute.xlu1 %1392 }
0x1927   :  { %3831 = vmatprep.subr.msk.mxu1 %vm1219_vm2, %v1393_v23 }
0x1928   :  { %v1480_v24 = vpop.permute.xlu0 %1479  ;;  %3832 = vmatpush3.xpose.msk.msra.mxu1 %vm1219_vm2, %v1393_v23 }
0x1929   :  { %3829 = vmatmul.mubr.msk.f32.vlgmr.msra.gmra.mxu0 %vm1219_vm2, %v1180_v0  ;;  %3838 = vmatprep.subr.msk.mxu0 %vm1219_vm2, %v1480_v24 }
0x192a   :  { %3839 = vmatpush3.xpose.msk.msra.mxu0 %vm1219_vm2, %v1480_v24  ;;  %3842 = vmatprep.mubr.msk.f32.mxu0 %vm1219_vm2, %v1186_v6  ;;  %v1391_v17 = vpop.permute.xlu1 %1390 }
0x192b   :  { %3833 = vmatprep.subr.msk.mxu1 %vm1219_vm2, %v1391_v17 }
0x192c   :  { %v1478_v25 = vpop.permute.xlu0 %1477  ;;  %3834 = vmatpush3.xpose.msk.msra.mxu1 %vm1219_vm2, %v1391_v17 }
0x192d   :  { %3840 = vmatprep.subr.msk.mxu0 %vm1219_vm2, %v1478_v25 }
0x192e   :  { %3841 = vmatpush3.xpose.msk.msra.mxu0 %vm1219_vm2, %v1478_v25  ;;  %v1567_v34 = vpop.permute.xlu1 %1566 }
0x192f   :  { %3836 = vmatmul.mubr.msk.f32.vlgmr.msra.gmra.mxu1 %vm1219_vm2, %v4480_v4  ;;  %3845 = vmatprep.subr.msk.mxu1 %vm1219_vm2, %v1567_v34 }
0x1930   :  { %v1654_v9 = vpop.permute.xlu0 %1653  ;;  %3846 = vmatpush3.xpose.msk.msra.mxu1 %vm1219_vm2, %v1567_v34  ;;  %3849 = vmatprep.mubr.msk.f32.mxu1 %vm1219_vm2, %v1190_v31 }
0x1931   :  { %3843 = vmatmul.mubr.msk.f32.vlgmr.msra.gmra.mxu0 %vm1219_vm2, %v4477_v3  ;;  %3852 = vmatprep.subr.msk.mxu0 %vm1219_vm2, %v1654_v9 }
0x1932   :  { %3853 = vmatpush3.xpose.msk.msra.mxu0 %vm1219_vm2, %v1654_v9  ;;  %3856 = vmatprep.mubr.msk.f32.mxu0 %vm1219_vm2, %v4494_v13  ;;  %v1565_v26 = vpop.permute.xlu1 %1564 }
0x1933   :  { %3847 = vmatprep.subr.msk.mxu1 %vm1219_vm2, %v1565_v26 }
0x1934   :  { %v1652_v12 = vpop.permute.xlu0 %1651  ;;  %3848 = vmatpush3.xpose.msk.msra.mxu1 %vm1219_vm2, %v1565_v26 }
0x1935   :  { %3854 = vmatprep.subr.msk.mxu0 %vm1219_vm2, %v1652_v12 }
0x1936   :  { %3855 = vmatpush3.xpose.msk.msra.mxu0 %vm1219_vm2, %v1652_v12  ;;  %v1741_v27 = vpop.permute.xlu1 %1740 }
0x1937   :  { %3850 = vmatmul.mubr.msk.f32.vlgmr.msra.gmra.mxu1 %vm1219_vm2, %v4490_v11  ;;  %3859 = vmatprep.subr.msk.mxu1 %vm1219_vm2, %v1741_v27 }
0x1938   :  { %v1828_v28 = vpop.permute.xlu0 %1827  ;;  %3860 = vmatpush3.xpose.msk.msra.mxu1 %vm1219_vm2, %v1741_v27  ;;  %3863 = vmatprep.mubr.msk.f32.mxu1 %vm1219_vm2, %v4509_v18 }
0x1939   :  { %3857 = vmatmul.mubr.msk.f32.vlgmr.msra.gmra.mxu0 %vm1219_vm2, %v4487_v10  ;;  %3866 = vmatprep.subr.msk.mxu0 %vm1219_vm2, %v1828_v28 }
0x193a   :  { %3867 = vmatpush3.xpose.msk.msra.mxu0 %vm1219_vm2, %v1828_v28  ;;  %3870 = vmatprep.mubr.msk.f32.mxu0 %vm1219_vm2, %v4513_v20  ;;  %v1739_v14 = vpop.permute.xlu1 %1738 }
0x193b   :  { %3861 = vmatprep.subr.msk.mxu1 %vm1219_vm2, %v1739_v14 }
0x193c   :  { %v1826_v29 = vpop.permute.xlu0 %1825  ;;  %3862 = vmatpush3.xpose.msk.msra.mxu1 %vm1219_vm2, %v1739_v14 }
0x193d   :  { %3868 = vmatprep.subr.msk.mxu0 %vm1219_vm2, %v1826_v29 }
0x193e   :  { %3869 = vmatpush3.xpose.msk.msra.mxu0 %vm1219_vm2, %v1826_v29  ;;  %v2090_v30 = vpop.permute.xlu1 %2089 }
0x193f   :  { %3864 = vmatmul.mubr.msk.f32.vlgmr.msra.gmra.mxu1 %vm1219_vm2, %v4503_v16 }
0x1940   :  { %v2092_v32 = vpop.permute.xlu0 %2091 }
0x1941   :  { %3871 = vmatmul.mubr.msk.f32.vlgmr.msra.gmra.mxu0 %vm1219_vm2, %v4501_v15  ;;  %3873 = vmatprep.subr.mxu1 %v2092_v32 }
0x1942   :  { %v4589_v35 = vpop.permute.xlu1 %2178  ;;  %3874 = vmatpush3.msra.mxu1 %v2092_v32 }
0x1943   :  { %3875 = vmatprep.subr.mxu1 %v2090_v30 }
0x1944   :  { %3876 = vmatpush3.msra.mxu1 %v2090_v30 }
0x1945   :  { %3880 = vmatprep.subr.mxu1 %v4589_v35 }
0x1946   :  { %v2266_v36 = vpop.permute.xlu1 %2265 }
0x1947   :  { %3887 = vmatprep.subr.mxu0 %v2266_v36 }
0x1948   :  { %3888 = vmatpush3.msra.mxu0 %v2266_v36 }
0x194a   :  { %v4592_v37 = vpop.permute.xlu1 %2439 }
0x194e   :  { %v2264_v38 = vpop.permute.xlu1 %2263 }
0x194f   :  { %3889 = vmatprep.subr.mxu0 %v2264_v38 }
0x1950   :  { %3890 = vmatpush3.msra.mxu0 %v2264_v38 }
0x1951   :  { %3901 = vmatprep.subr.mxu0 %v4592_v37 }
0x1994   :  { %v3823_v49 = vpop.f32.mrf.mxu1 }
0x1995   :  { %v4605_v51 = vadd.f32 %v3823_v49, %v1214_v48 }
0x1996   :  { %v1294_v19 = vpop.f32.mrf.mxu1 }
0x1997   :  { %v4607_v52 = vadd.f32 %v1294_v19, %v1213_v50  ;;  %v1916_v22 = vsel %vm1912_vm5, %v4605_v51, -inf }
0x1998   :  { %1917 = vmax.xlane.f32.xlu0 %v1916_v22 }
0x1999   :  { %v1913_v33 = vsel %vm1912_vm5, %v4607_v52, -inf }
0x199a   :  { %1914 = vmax.xlane.f32.xlu1 %v1913_v33  ;;  %v4681_v33 = vpop.permute.xlu1 %2437 }
0x19e9   :  { %v3830_v53 = vpop.f32.mrf.mxu0 }
0x19ea   :  { %v4613_v55 = vadd.f32 %v3830_v53, %v1214_v48 }
0x19eb   :  { %v1381_v56 = vpop.f32.mrf.mxu0 }
0x19ec   :  { %v4615_v57 = vadd.f32 %v1381_v56, %v1213_v50  ;;  %v1922_v58 = vsel %vm1912_vm5, %v4613_v55, -inf }
0x19ed   :  { %1923 = vmax.xlane.f32.xlu1 %v1922_v58 }
0x19ee   :  { %v1919_v60 = vsel %vm1912_vm5, %v4615_v57, -inf }
0x19ef   :  { %1920 = vmax.xlane.f32.xlu0 %v1919_v60  ;;  %v3837_v61 = vpop.f32.mrf.mxu1 }
0x19f0   :  { %v4621_v62 = vadd.f32 %v3837_v61, %v1214_v48 }
0x19f1   :  { %v1468_v63 = vpop.f32.mrf.mxu1  ;;  %v3844_v0 = vpop.f32.mrf.mxu0 }
0x19f2   :  { %v4623_v2 = vadd.f32 %v1468_v63, %v1213_v50  ;;  %v4625_v3 = vadd.f32 %v3844_v0, %v1214_v48  ;;  %v1928_v4 = vsel %vm1912_vm5, %v4621_v62, -inf }
0x19f3   :  { %v1555_v6 = vpop.f32.mrf.mxu0  ;;  %1929 = vmax.xlane.f32.xlu1 %v1928_v4 }
0x19f4   :  { %v4629_v7 = vadd.f32 %v1555_v6, %v1213_v50  ;;  %v1925_v10 = vsel %vm1912_vm5, %v4623_v2, -inf  ;;  %v1934_v11 = vsel %vm1912_vm5, %v4625_v3, -inf }
0x19f5   :  { %1926 = vmax.xlane.f32.xlu0 %v1925_v10 }
0x19f6   :  { %v1931_v54 = vsel %vm1912_vm5, %v4629_v7, -inf }
0x19f7   :  { %v3851_v31 = vpop.f32.mrf.mxu1  ;;  %1935 = vmax.xlane.f32.xlu1 %v1934_v11 }
0x19f8   :  { %v4635_v5 = vadd.f32 %v3851_v31, %v1214_v48 }
0x19f9   :  { %v1642_v21 = vpop.f32.mrf.mxu1  ;;  %v3858_v8 = vpop.f32.mrf.mxu0  ;;  %1932 = vmax.xlane.f32.xlu0 %v1931_v54 }
0x19fa   :  { %v4639_v23 = vadd.f32 %v1642_v21, %v1213_v50  ;;  %v4641_v24 = vadd.f32 %v3858_v8, %v1214_v48  ;;  %v1940_v17 = vsel %vm1912_vm5, %v4635_v5, -inf }
0x19fb   :  { %v1729_v25 = vpop.f32.mrf.mxu0  ;;  %1941 = vmax.xlane.f32.xlu1 %v1940_v17 }
0x19fc   :  { %v4645_v34 = vadd.f32 %v1729_v25, %v1213_v50  ;;  %v1937_v9 = vsel %vm1912_vm5, %v4639_v23, -inf  ;;  %v1946_v26 = vsel %vm1912_vm5, %v4641_v24, -inf }
0x19fd   :  { %1938 = vmax.xlane.f32.xlu0 %v1937_v9 }
0x19fe   :  { %v1943_v28 = vsel %vm1912_vm5, %v4645_v34, -inf }
0x19ff   :  { %v3865_v12 = vpop.f32.mrf.mxu1  ;;  %1947 = vmax.xlane.f32.xlu1 %v1946_v26 }
0x1a00   :  { %v4651_v27 = vadd.f32 %v3865_v12, %v1214_v48 }
0x1a01   :  { %v1816_v14 = vpop.f32.mrf.mxu1  ;;  %v3872_v29 = vpop.f32.mrf.mxu0  ;;  %1944 = vmax.xlane.f32.xlu0 %v1943_v28 }
0x1a02   :  { %v4655_v30 = vadd.f32 %v1816_v14, %v1213_v50  ;;  %v4657_v32 = vadd.f32 %v3872_v29, %v1214_v48  ;;  %v1952_v36 = vsel %vm1912_vm5, %v4651_v27, -inf  ;;  %v4669_v48 = vpop.permute.xlu0 %2352 }
0x1a03   :  { %v1903_v38 = vpop.f32.mrf.mxu0  ;;  %1953 = vmax.xlane.f32.xlu1 %v1952_v36 }
0x1a04   :  { %v4661_v43 = vadd.f32 %v1903_v38, %v1213_v50  ;;  %v1949_v44 = vsel %vm1912_vm5, %v4655_v30, -inf  ;;  %v1958_v46 = vsel %vm1912_vm5, %v4657_v32, -inf }
0x1a05   :  { %1950 = vmax.xlane.f32.xlu0 %v1949_v44 }
0x1a06   :  { %v1955_v47 = vsel %vm1912_vm5, %v4661_v43, -inf  ;;  %v4671_v49 = vpop.permute.xlu0 %2526 }
0x1a07   :  { %1959 = vmax.xlane.f32.xlu1 %v1958_v46 }
0x1a09   :  { %1956 = vmax.xlane.f32.xlu0 %v1955_v47 }
0x1a0a   :  { %v4673_v19 = vpop.permute.xlu0 %2176 }
0x1a0e   :  { %v4677_v50 = vpop.permute.xlu0 %2350 }
0x1a18   :  { %2613 = vrot.lane.b32.xlu1 %v4503_v16, %s4190_s23 }
0x1a1f   :  { %2524 = vrot.lane.b32.xlu0 %v4494_v13, %s4190_s23 }
0x1a21   :  { %v1918_v22 = vpop.xlane.xlu0 %1917 }
0x1a22   :  { %v1962_v53 = vsub.f32 %v4605_v51, %v1918_v22 }
0x1a23   :  { %2700 = vrot.lane.b32.xlu0 %v4501_v15, %s4190_s23  ;;  %v1915_v56 = vpop.xlane.xlu1 %1914 }
0x1a24   :  { %v1979_v58 = vmul.f32 1.442695, %v1962_v53  ;;  %v1961_v60 = vsub.f32 %v4607_v52, %v1915_v56 }
0x1a26   :  { %4092 = vpow2.f32 %v1979_v58  ;;  %v1977_v61 = vmul.f32 1.442695, %v1961_v60 }
0x1a28   :  { %4094 = vpow2.f32 %v1977_v61 }
0x1a33   :  { %v4687_v16 = vpop.eup %4092 }
0x1a34   :  { %v2012_v13 = vsel %vm1912_vm5, %v4687_v16, 0.0 }
0x1a35   :  { %v4691_v63 = vpop.eup %4094 }
0x1a36   :  { %v2009_v51 = vsel %vm1912_vm5, %v4691_v63, 0.0 }
0x1a3c   :  { %2013 = vadd.xlane.f32.xlu1 %v2012_v13 }
0x1a42   :  { %2010 = vadd.xlane.f32.xlu0 %v2009_v51 }
0x1a76   :  { %v1924_v15 = vpop.xlane.xlu1 %1923 }
0x1a77   :  { %v1964_v0 = vsub.f32 %v4613_v55, %v1924_v15 }
0x1a78   :  { %v1921_v4 = vpop.xlane.xlu0 %1920 }
0x1a79   :  { %v1983_v52 = vmul.f32 1.442695, %v1964_v0  ;;  %v1963_v6 = vsub.f32 %v4615_v57, %v1921_v4 }
0x1a7b   :  { %4096 = vpow2.f32 %v1983_v52  ;;  %v1981_v10 = vmul.f32 1.442695, %v1963_v6 }
0x1a7c   :  { %v1930_v11 = vpop.xlane.xlu1 %1929 }
0x1a7d   :  { %4098 = vpow2.f32 %v1981_v10  ;;  %v1966_v31 = vsub.f32 %v4621_v62, %v1930_v11 }
0x1a7e   :  { %v1927_v54 = vpop.xlane.xlu0 %1926 }
0x1a7f   :  { %v1987_v21 = vmul.f32 1.442695, %v1966_v31  ;;  %v1965_v8 = vsub.f32 %v4623_v2, %v1927_v54 }
0x1a80   :  { %v1936_v17 = vpop.xlane.xlu1 %1935 }
0x1a81   :  { %4100 = vpow2.f32 %v1987_v21  ;;  %v1985_v25 = vmul.f32 1.442695, %v1965_v8  ;;  %v1968_v9 = vsub.f32 %v4625_v3, %v1936_v17 }
0x1a82   :  { %v1933_v55 = vpop.xlane.xlu0 %1932 }
0x1a83   :  { %4102 = vpow2.f32 %v1985_v25  ;;  %v1991_v26 = vmul.f32 1.442695, %v1968_v9  ;;  %v1967_v57 = vsub.f32 %v4629_v7, %v1933_v55 }
0x1a84   :  { %v1942_v12 = vpop.xlane.xlu1 %1941 }
0x1a85   :  { %4104 = vpow2.f32 %v1991_v26  ;;  %v1989_v28 = vmul.f32 1.442695, %v1967_v57  ;;  %v1970_v14 = vsub.f32 %v4635_v5, %v1942_v12 }
0x1a86   :  { %v1939_v62 = vpop.xlane.xlu0 %1938 }
0x1a87   :  { %4106 = vpow2.f32 %v1989_v28  ;;  %v1995_v29 = vmul.f32 1.442695, %v1970_v14  ;;  %v1969_v2 = vsub.f32 %v4639_v23, %v1939_v62 }
0x1a88   :  { %v4703_v36 = vpop.eup %4096  ;;  %v1948_v38 = vpop.xlane.xlu1 %1947 }
0x1a89   :  { %4108 = vpow2.f32 %v1995_v29  ;;  %v1993_v3 = vmul.f32 1.442695, %v1969_v2  ;;  %v1972_v44 = vsub.f32 %v4641_v24, %v1948_v38  ;;  %v2018_v7 = vsel %vm1912_vm5, %v4703_v36, 0.0 }
0x1a8a   :  { %v4708_v46 = vpop.eup %4098  ;;  %v1945_v47 = vpop.xlane.xlu0 %1944  ;;  %2019 = vadd.xlane.f32.xlu1 %v2018_v7 }
0x1a8b   :  { %4110 = vpow2.f32 %v1993_v3  ;;  %v1999_v5 = vmul.f32 1.442695, %v1972_v44  ;;  %v1971_v22 = vsub.f32 %v4645_v34, %v1945_v47  ;;  %v2015_v23 = vsel %vm1912_vm5, %v4708_v46, 0.0 }
0x1a8c   :  { %2016 = vadd.xlane.f32.xlu0 %v2015_v23  ;;  %v1954_v53 = vpop.xlane.xlu1 %1953 }
0x1a8d   :  { %4112 = vpow2.f32 %v1999_v5  ;;  %v1997_v56 = vmul.f32 1.442695, %v1971_v22  ;;  %v1974_v24 = vsub.f32 %v4651_v27, %v1954_v53 }
0x1a8e   :  { %v4714_v58 = vpop.eup %4100  ;;  %v1951_v60 = vpop.xlane.xlu0 %1950 }
0x1a8f   :  { %4114 = vpow2.f32 %v1997_v56  ;;  %v2003_v61 = vmul.f32 1.442695, %v1974_v24  ;;  %v1973_v13 = vsub.f32 %v4655_v30, %v1951_v60  ;;  %v2024_v51 = vsel %vm1912_vm5, %v4714_v58, 0.0 }
0x1a90   :  { %v4719_v34 = vpop.eup %4102  ;;  %2025 = vadd.xlane.f32.xlu1 %v2024_v51  ;;  %v1960_v15 = vpop.xlane.xlu1 %1959 }
0x1a91   :  { %4116 = vpow2.f32 %v2003_v61  ;;  %v2001_v0 = vmul.f32 1.442695, %v1973_v13  ;;  %v1976_v4 = vsub.f32 %v4657_v32, %v1960_v15  ;;  %v2021_v27 = vsel %vm1912_vm5, %v4719_v34, 0.0 }
0x1a92   :  { %v4724_v52 = vpop.eup %4104  ;;  %v1957_v6 = vpop.xlane.xlu0 %1956  ;;  %2022 = vadd.xlane.f32.xlu0 %v2021_v27 }
0x1a93   :  { %4118 = vpow2.f32 %v2001_v0  ;;  %v2007_v30 = vmul.f32 1.442695, %v1976_v4  ;;  %v1975_v10 = vsub.f32 %v4661_v43, %v1957_v6  ;;  %v2030_v11 = vsel %vm1912_vm5, %v4724_v52, 0.0 }
0x1a94   :  { %v4729_v31 = vpop.eup %4106  ;;  %2031 = vadd.xlane.f32.xlu1 %v2030_v11  ;;  %v4775_v44 = vpop.permute.xlu1 %2613 }
0x1a95   :  { %4120 = vpow2.f32 %v2007_v30  ;;  %v2005_v54 = vmul.f32 1.442695, %v1975_v10  ;;  %v2027_v32 = vsel %vm1912_vm5, %v4729_v31, 0.0 }
0x1a96   :  { %v4733_v21 = vpop.eup %4108  ;;  %2028 = vadd.xlane.f32.xlu0 %v2027_v32  ;;  %v4773_v3 = vpop.permute.xlu0 %2524 }
0x1a97   :  { %4122 = vpow2.f32 %v2005_v54  ;;  %v2036_v8 = vsel %vm1912_vm5, %v4733_v21, 0.0 }
0x1a98   :  { %v4737_v17 = vpop.eup %4110  ;;  %2037 = vadd.xlane.f32.xlu1 %v2036_v8 }
0x1a99   :  { %v2033_v43 = vsel %vm1912_vm5, %v4737_v17, 0.0 }
0x1a9a   :  { %v4741_v25 = vpop.eup %4112  ;;  %2034 = vadd.xlane.f32.xlu0 %v2033_v43  ;;  %v4779_v7 = vpop.permute.xlu0 %2700 }
0x1a9b   :  { %v2042_v9 = vsel %vm1912_vm5, %v4741_v25, 0.0 }
0x1a9c   :  { %v4745_v55 = vpop.eup %4114  ;;  %2043 = vadd.xlane.f32.xlu1 %v2042_v9 }
0x1a9d   :  { %v2039_v26 = vsel %vm1912_vm5, %v4745_v55, 0.0 }
0x1a9e   :  { %v4749_v57 = vpop.eup %4116  ;;  %2040 = vadd.xlane.f32.xlu0 %v2039_v26 }
0x1a9f   :  { %v2048_v12 = vsel %vm1912_vm5, %v4749_v57, 0.0 }
0x1aa0   :  { %v4753_v28 = vpop.eup %4118  ;;  %2049 = vadd.xlane.f32.xlu1 %v2048_v12 }
0x1aa1   :  { %v2045_v14 = vsel %vm1912_vm5, %v4753_v28, 0.0 }
0x1aa2   :  { %v4757_v62 = vpop.eup %4120  ;;  %2046 = vadd.xlane.f32.xlu0 %v2045_v14 }
0x1aa3   :  { %v2054_v29 = vsel %vm1912_vm5, %v4757_v62, 0.0 }
0x1aa4   :  { %v4761_v2 = vpop.eup %4122  ;;  %2055 = vadd.xlane.f32.xlu1 %v2054_v29 }
0x1aa5   :  { %v2051_v38 = vsel %vm1912_vm5, %v4761_v2, 0.0 }
0x1aa6   :  { %2052 = vadd.xlane.f32.xlu0 %v2051_v38 }
0x1ab5   :  { %2611 = vrot.lane.b32.xlu1 %v4509_v18, %s4190_s23 }
0x1ab9   :  { %2868 = vrot.lane.b32.xlu1 %v4443_v41, %s4191_s24 }
0x1abc   :  { %2698 = vrot.lane.b32.xlu0 %v4513_v20, %s4190_s23 }
0x1ac0   :  { %2870 = vrot.lane.b32.xlu0 %v4439_v40, %s4191_s24 }
0x1ac4   :  { %2866 = vrot.lane.b32.xlu0 %v4447_v42, %s4191_s24 }
0x1ac5   :  { %v2014_v47 = vpop.xlane.xlu1 %2013 }
0x1ac6   :  { %4124 = vrcp.f32 %v2014_v47 }
0x1acb   :  { %v2011_v18 = vpop.xlane.xlu0 %2010 }
0x1acc   :  { %4126 = vrcp.f32 %v2011_v18 }
0x1ad3   :  { %v4125_v41 = vpop.eup %4124 }
0x1ad4   :  { %v2074_v22 = vmul.f32 %v4125_v41, %v4687_v16 }
0x1ad9   :  { %v4127_v5 = vpop.eup %4126 }
0x1ada   :  { %v2073_v20 = vmul.f32 %v4127_v5, %v4691_v63 }
0x1adc   :  { %3877 = vmatprep.mubr.msk.f32.mxu1 %vm1912_vm5, %v2073_v20 }
0x1add   :  { %3878 = vmatmul.mubr.msk.f32.vlgmr.msra.gmra.mxu1 %vm1912_vm5, %v2074_v22 }
0x1ade   :  { %3881 = vmatpush3.msra.mxu1 %v4589_v35 }
0x1adf   :  { %3882 = vmatprep.subr.mxu1 %v4673_v19 }
0x1ae0   :  { %3883 = vmatpush3.msra.mxu1 %v4673_v19 }
0x1ae1   :  { %3894 = vmatprep.subr.mxu1 %v4669_v48 }
0x1b13   :  { %v2020_v40 = vpop.xlane.xlu1 %2019 }
0x1b14   :  { %4128 = vrcp.f32 %v2020_v40 }
0x1b15   :  { %v2017_v42 = vpop.xlane.xlu0 %2016 }
0x1b16   :  { %4130 = vrcp.f32 %v2017_v42 }
0x1b19   :  { %v2026_v23 = vpop.xlane.xlu1 %2025 }
0x1b1a   :  { %4132 = vrcp.f32 %v2026_v23 }
0x1b1b   :  { %v2023_v63 = vpop.xlane.xlu0 %2022 }
0x1b1c   :  { %4134 = vrcp.f32 %v2023_v63  ;;  %v4160_v63 = vld [vmem:[#allocation3 + $0x60] sm:$0xff] }
0x1b1d   :  { %v2032_v16 = vpop.xlane.xlu1 %2031 }
0x1b1e   :  { %4136 = vrcp.f32 %v2032_v16  ;;  %v4839_v16 = vld [vmem:[#allocation3 + $0x98] sm:$0xff] }
0x1b1f   :  { %v2029_v53 = vpop.xlane.xlu0 %2028 }
0x1b20   :  { %4138 = vrcp.f32 %v2029_v53  ;;  %v4845_v53 = vld [vmem:[#allocation3 + $0x90] sm:$0xff] }
0x1b21   :  { %v2038_v56 = vpop.xlane.xlu1 %2037  ;;  %v4129_v35 = vpop.eup %4128 }
0x1b22   :  { %4140 = vrcp.f32 %v2038_v56  ;;  %v2076_v13 = vmul.f32 %v4129_v35, %v4703_v36  ;;  %v4851_v56 = vld [vmem:[#allocation3 + $0x88] sm:$0xff] }
0x1b23   :  { %v4131_v24 = vpop.eup %4130  ;;  %v2035_v60 = vpop.xlane.xlu0 %2034 }
0x1b24   :  { %4142 = vrcp.f32 %v2035_v60  ;;  %v2075_v19 = vmul.f32 %v4131_v24, %v4708_v46 }
0x1b25   :  { %v2044_v61 = vpop.xlane.xlu1 %2043 }
0x1b26   :  { %3884 = vmatprep.mubr.msk.f32.mxu1 %vm1912_vm5, %v2075_v19  ;;  %4144 = vrcp.f32 %v2044_v61 }
0x1b27   :  { %v2041_v51 = vpop.xlane.xlu0 %2040  ;;  %3885 = vmatmul.mubr.msk.f32.vlgmr.msra.gmra.mxu1 %vm1912_vm5, %v2076_v13  ;;  %v4133_v15 = vpop.eup %4132 }
0x1b28   :  { %4146 = vrcp.f32 %v2041_v51  ;;  %3895 = vmatpush3.msra.mxu1 %v4669_v48  ;;  %v2078_v27 = vmul.f32 %v4133_v15, %v4714_v58 }
0x1b29   :  { %v4135_v0 = vpop.eup %4134  ;;  %3896 = vmatprep.subr.mxu1 %v4677_v50  ;;  %v2050_v4 = vpop.xlane.xlu1 %2049 }
0x1b2a   :  { %3897 = vmatpush3.msra.mxu1 %v4677_v50  ;;  %v2077_v46 = vmul.f32 %v4135_v0, %v4719_v34  ;;  %4148 = vrcp.f32 %v2050_v4 }
0x1b2b   :  { %3908 = vmatprep.subr.mxu1 %v4671_v49  ;;  %v2047_v36 = vpop.xlane.xlu0 %2046  ;;  %v4137_v6 = vpop.eup %4136 }
0x1b2c   :  { %4150 = vrcp.f32 %v2047_v36  ;;  %3891 = vmatprep.mubr.msk.f32.mxu0 %vm1912_vm5, %v2077_v46  ;;  %v2080_v10 = vmul.f32 %v4137_v6, %v4724_v52 }
0x1b2d   :  { %v4139_v30 = vpop.eup %4138  ;;  %3892 = vmatmul.mubr.msk.f32.vlgmr.msra.gmra.mxu0 %vm1912_vm5, %v2078_v27  ;;  %v2056_v48 = vpop.xlane.xlu1 %2055 }
0x1b2e   :  { %3902 = vmatpush3.msra.mxu0 %v4592_v37  ;;  %v2079_v50 = vmul.f32 %v4139_v30, %v4729_v31  ;;  %4152 = vrcp.f32 %v2056_v48 }
0x1b2f   :  { %3903 = vmatprep.subr.mxu0 %v4681_v33  ;;  %v2053_v34 = vpop.xlane.xlu0 %2052  ;;  %v4141_v11 = vpop.eup %4140 }
0x1b30   :  { %4154 = vrcp.f32 %v2053_v34  ;;  %3904 = vmatpush3.msra.mxu0 %v4681_v33  ;;  %3898 = vmatprep.mubr.msk.f32.mxu1 %vm1912_vm5, %v2079_v50  ;;  %v2082_v31 = vmul.f32 %v4141_v11, %v4733_v21 }
0x1b31   :  { %v4143_v58 = vpop.eup %4142  ;;  %3915 = vmatprep.subr.mxu0 %v4775_v44  ;;  %3899 = vmatmul.mubr.msk.f32.vlgmr.msra.gmra.mxu1 %vm1912_vm5, %v2080_v10  ;;  %v2612_v54 = vpop.permute.xlu1 %2611 }
0x1b32   :  { %3909 = vmatpush3.msra.mxu1 %v4671_v49  ;;  %v2081_v37 = vmul.f32 %v4143_v58, %v4737_v17 }
0x1b33   :  { %3910 = vmatprep.subr.mxu1 %v4773_v3  ;;  %v4145_v52 = vpop.eup %4144  ;;  %v2699_v17 = vpop.permute.xlu0 %2698 }
0x1b34   :  { %3911 = vmatpush3.msra.mxu1 %v4773_v3  ;;  %3905 = vmatprep.mubr.msk.f32.mxu0 %vm1912_vm5, %v2081_v37  ;;  %v2084_v32 = vmul.f32 %v4145_v52, %v4741_v25 }
0x1b35   :  { %v4147_v33 = vpop.eup %4146  ;;  %3922 = vmatprep.subr.mxu1 %v4779_v7  ;;  %3906 = vmatmul.mubr.msk.f32.vlgmr.msra.gmra.mxu0 %vm1912_vm5, %v2082_v31 }
0x1b36   :  { %3916 = vmatpush3.msra.mxu0 %v4775_v44  ;;  %v2083_v49 = vmul.f32 %v4147_v33, %v4745_v55 }
0x1b37   :  { %3917 = vmatprep.subr.mxu0 %v2612_v54  ;;  %v4149_v8 = vpop.eup %4148 }
0x1b38   :  { %3918 = vmatpush3.msra.mxu0 %v2612_v54  ;;  %3912 = vmatprep.mubr.msk.f32.mxu1 %vm1912_vm5, %v2083_v49  ;;  %v2086_v9 = vmul.f32 %v4149_v8, %v4749_v57  ;;  %v2871_v57 = vpop.permute.xlu0 %2870 }
0x1b39   :  { %v4151_v21 = vpop.eup %4150  ;;  %3913 = vmatmul.mubr.msk.f32.vlgmr.msra.gmra.mxu1 %vm1912_vm5, %v2084_v32  ;;  %3929 = vmatprep.subr.mxu0 %v2871_v57 }
0x1b3a   :  { %3923 = vmatpush3.msra.mxu1 %v4779_v7  ;;  %v2085_v43 = vmul.f32 %v4151_v21, %v4753_v28  ;;  %v2869_v28 = vpop.permute.xlu1 %2868 }
0x1b3b   :  { %3924 = vmatprep.subr.mxu1 %v2699_v17  ;;  %v4153_v26 = vpop.eup %4152 }
0x1b3c   :  { %3925 = vmatpush3.msra.mxu1 %v2699_v17  ;;  %3919 = vmatprep.mubr.msk.f32.mxu0 %vm1912_vm5, %v2085_v43  ;;  %v2088_v12 = vmul.f32 %v4153_v26, %v4757_v62  ;;  %v2867_v14 = vpop.permute.xlu0 %2866 }
0x1b3d   :  { %v4155_v25 = vpop.eup %4154  ;;  %3920 = vmatmul.mubr.msk.f32.vlgmr.msra.gmra.mxu0 %vm1912_vm5, %v2086_v9  ;;  %3940 = vmatprep.subr.mxu1 %v4187_v1 }
0x1b3e   :  { %v2087_v55 = vmul.f32 %v4155_v25, %v4761_v2  ;;  %3930 = vmatpush3.msra.mxu0 %v2871_v57 }
0x1b3f   :  { %3931 = vmatprep.subr.mxu0 %v2869_v28 }
0x1b40   :  { %3926 = vmatprep.mubr.msk.f32.mxu1 %vm1912_vm5, %v2087_v55  ;;  %3932 = vmatpush3.msra.mxu0 %v2869_v28 }
0x1b41   :  { %3927 = vmatmul.mubr.msk.f32.vlgmr.msra.gmra.mxu1 %vm1912_vm5, %v2088_v12  ;;  %3933 = vmatprep.subr.mxu0 %v2867_v14 }
0x1b42   :  { %3944 = vmatprep.mubr.msk.f32.mxu1 %vm4189_vm0, %v4187_v1  ;;  %3934 = vmatpush3.msra.mxu0 %v2867_v14  ;;  %v3542_v14 = vsel %vm2965_vm12, 1.0, %v4187_v1 }
0x1b9d   :  { %v4834_v29 = vpop.f32.mrf.mxu1 }
0x1b9f   :  { %v2167_v2 = vpop.f32.mrf.mxu1 }
0x1be7   :  { %v3886_v62 = vpop.f32.mrf.mxu1 }
0x1be8   :  { %2789 = vrot.lane.b32.xlu1 %v3886_v62, %s4201_s10 }
0x1be9   :  { %v2254_v44 = vpop.f32.mrf.mxu1 }
0x1bed   :  { %v3893_v38 = vpop.f32.mrf.mxu0 }
0x1bee   :  { %2797 = vrot.lane.b32.xlu1 %v3893_v38, %s4185_s16 }
0x1bef   :  { %v2341_v3 = vpop.f32.mrf.mxu0 }
0x1bf0   :  { %2795 = vrot.lane.b32.xlu0 %v2341_v3, %s4185_s16 }
0x1bf1   :  { %v3900_v7 = vpop.f32.mrf.mxu1 }
0x1bf2   :  { %2787 = vrot.lane.b32.xlu1 %v2254_v44, %s4201_s10 }
0x1bf3   :  { %v2428_v41 = vpop.f32.mrf.mxu1 }
0x1bf4   :  { %2805 = vrot.lane.b32.xlu0 %v3900_v7, %s4202_s11 }
0x1bf5   :  { %v3907_v47 = vpop.f32.mrf.mxu0 }
0x1bf7   :  { %v2515_v18 = vpop.f32.mrf.mxu0 }
0x1bf8   :  { %2813 = vrot.lane.b32.xlu0 %v3907_v47, %s4203_s12  ;;  %2811 = vrot.lane.b32.xlu1 %v2515_v18, %s4203_s12 }
0x1bf9   :  { %v3914_v5 = vpop.f32.mrf.mxu1 }
0x1bfb   :  { %v2602_v22 = vpop.f32.mrf.mxu1 }
0x1bfc   :  { %2803 = vrot.lane.b32.xlu0 %v2428_v41, %s4202_s11  ;;  %2821 = vrot.lane.b32.xlu1 %v3914_v5, %s4204_s13 }
0x1bfd   :  { %v3921_v20 = vpop.f32.mrf.mxu0 }
0x1bff   :  { %v2689_v40 = vpop.f32.mrf.mxu0 }
0x1c00   :  { %2829 = vrot.lane.b32.xlu1 %v3921_v20, %s4205_s14  ;;  %2827 = vrot.lane.b32.xlu0 %v2689_v40, %s4205_s14 }
0x1c01   :  { %v3928_v42 = vpop.f32.mrf.mxu1 }
0x1c03   :  { %v2776_v23 = vpop.f32.mrf.mxu1 }
0x1c04   :  { %2819 = vrot.lane.b32.xlu1 %v2602_v22, %s4204_s13  ;;  %2835 = vrot.lane.b32.xlu0 %v2776_v23, %s4206_s15 }
0x1c08   :  { %2864 = vrot.lane.b32.xlu1 %v4160_v63, %s4191_s24  ;;  %2837 = vrot.lane.b32.xlu0 %v3928_v42, %s4206_s15 }
0x1c0c   :  { %2877 = vrot.lane.b32.xlu1 %v4456_v59, %s4191_s24  ;;  %3126 = vrot.lane.b32.xlu0 %v4839_v16, %s4197_s7  ;;  %v4857_v59 = vld [vmem:[#allocation3 + $0x80] sm:$0xff] }
0x1c10   :  { %3124 = vrot.lane.b32.xlu1 %v4845_v53, %s4197_s7  ;;  %3211 = vrot.lane.b32.xlu0 %v4839_v16, %s4192_s27 }
0x1c14   :  { %3122 = vrot.lane.b32.xlu1 %v4851_v56, %s4197_s7  ;;  %3209 = vrot.lane.b32.xlu0 %v4845_v53, %s4192_s27 }
0x1c18   :  { %3120 = vrot.lane.b32.xlu1 %v4857_v59, %s4197_s7  ;;  %3207 = vrot.lane.b32.xlu0 %v4851_v56, %s4192_s27 }
0x1c1c   :  { %3205 = vrot.lane.b32.xlu1 %v4857_v59, %s4192_s27  ;;  %3303 = vrot.lane.b32.xlu0 %v4851_v56, %s4207_s18 }
0x1c20   :  { %3297 = vrot.lane.b32.xlu1 %v3547_v39, %s4190_s23  ;;  %3301 = vrot.lane.b32.xlu0 %v4857_v59, %s4207_s18 }
0x1c24   :  { %3307 = vrot.lane.b32.xlu1 %v3547_v39, %s4208_s2  ;;  %3384 = vrot.lane.b32.xlu0 %v4857_v59, %s4209_s19 }
0x1c28   :  { %3387 = vrot.lane.b32.xlu1 %v3547_v39, %s4210_s20 }
0x1c5a   :  { %v2790_v35 = vpop.permute.xlu1 %2789 }
0x1c5b   :  { %v2842_v30 = vsel %vm1219_vm2, %v4834_v29, %v2790_v35 }
0x1c60   :  { %v2798_v24 = vpop.permute.xlu1 %2797 }
0x1c61   :  { %v2845_v48 = vsel %vm2843_vm6, %v2842_v30, %v2798_v24 }
0x1c62   :  { %v2796_v60 = vpop.permute.xlu0 %2795 }
0x1c64   :  { %v2788_v19 = vpop.permute.xlu1 %2787 }
0x1c65   :  { %v2841_v4 = vsel %vm1219_vm2, %v2167_v2, %v2788_v19 }
0x1c66   :  { %v2806_v61 = vpop.permute.xlu0 %2805  ;;  %v2844_v46 = vsel %vm2843_vm6, %v2841_v4, %v2796_v60 }
0x1c67   :  { %v2848_v11 = vsel %vm2846_vm7, %v2845_v48, %v2806_v61 }
0x1c6a   :  { %v2814_v13 = vpop.permute.xlu0 %2813  ;;  %v2812_v51 = vpop.permute.xlu1 %2811 }
0x1c6b   :  { %v2850_v37 = vsel %vm1912_vm5, %v2848_v11, %v2814_v13 }
0x1c6e   :  { %v2804_v15 = vpop.permute.xlu0 %2803  ;;  %v2822_v0 = vpop.permute.xlu1 %2821 }
0x1c6f   :  { %v2847_v6 = vsel %vm2846_vm7, %v2844_v46, %v2804_v15  ;;  %v2853_v52 = vsel %vm2851_vm8, %v2850_v37, %v2822_v0 }
0x1c70   :  { %v2849_v34 = vsel %vm1912_vm5, %v2847_v6, %v2812_v51 }
0x1c72   :  { %v2828_v36 = vpop.permute.xlu0 %2827  ;;  %v2830_v27 = vpop.permute.xlu1 %2829 }
0x1c73   :  { %v2856_v54 = vsel %vm2854_vm11, %v2853_v52, %v2830_v27 }
0x1c76   :  { %v2836_v50 = vpop.permute.xlu0 %2835  ;;  %v2820_v10 = vpop.permute.xlu1 %2819 }
0x1c77   :  { %v2852_v58 = vsel %vm2851_vm8, %v2849_v34, %v2820_v10 }
0x1c78   :  { %v2855_v31 = vsel %vm2854_vm11, %v2852_v58, %v2828_v36 }
0x1c79   :  { %v2858_v33 = vsel %vm2857_vm9, %v2855_v31, %v2836_v50 }
0x1c7a   :  { %v2838_v49 = vpop.permute.xlu0 %2837  ;;  %3937 = vmatprep.mubr.msk.f32.mxu0 %vm155_vm10, %v2858_v33  ;;  %v2865_v32 = vpop.permute.xlu1 %2864 }
0x1c7b   :  { %v2859_v8 = vsel %vm2857_vm9, %v2856_v54, %v2838_v49  ;;  %3935 = vmatprep.subr.mxu0 %v2865_v32 }
0x1c7c   :  { %3936 = vmatpush3.msra.mxu0 %v2865_v32 }
0x1c7d   :  { %3938 = vmatmul.mubr.msk.f32.vlgmr.msra.gmra.mxu0 %vm155_vm10, %v2859_v8  ;;  %3958 = vmatprep.subr.mxu0 %v4187_v1 }
0x1c7e   :  { %v2878_v21 = vpop.permute.xlu1 %2877  ;;  %v3127_v17 = vpop.permute.xlu0 %3126  ;;  %3966 = vmatprep.mubr.msk.f32.mxu0 %vm4189_vm0, %v4187_v1 }
0x1c7f   :  { %3959 = vmatpush3.msra.mxu0 %v3127_v17 }
0x1c80   :  { %3960 = vmatprep.subr.mxu0 %v4187_v1 }
0x1c82   :  { %v3125_v43 = vpop.permute.xlu1 %3124  ;;  %v3212_v45 = vpop.permute.xlu0 %3211 }
0x1c83   :  { %3961 = vmatpush3.msra.mxu0 %v3125_v43 }
0x1c84   :  { %3962 = vmatprep.subr.mxu0 %v4187_v1 }
0x1c86   :  { %v3123_v9 = vpop.permute.xlu1 %3122  ;;  %v3210_v29 = vpop.permute.xlu0 %3209 }
0x1c87   :  { %3963 = vmatpush3.msra.mxu0 %v3123_v9 }
0x1c88   :  { %3964 = vmatprep.subr.mxu0 %v4187_v1 }
0x1c8a   :  { %v3121_v26 = vpop.permute.xlu1 %3120  ;;  %v3208_v44 = vpop.permute.xlu0 %3207 }
0x1c8b   :  { %3965 = vmatpush3.msra.mxu0 %v3121_v26 }
0x1c8c   :  { %3980 = vmatprep.subr.mxu0 %v4187_v1 }
0x1c8e   :  { %v3206_v7 = vpop.permute.xlu1 %3205  ;;  %v3304_v47 = vpop.permute.xlu0 %3303 }
0x1c92   :  { %v3302_v18 = vpop.permute.xlu0 %3301  ;;  %v3298_v40 = vpop.permute.xlu1 %3297 }
0x1d3d   :  { %v3939_v25 = vpop.f32.mrf.mxu0 }
0x1d3e   :  { %v2958_v55 = vadd.f32 %v3939_v25, %v2878_v21 }
0x1d3f   :  { %v2952_v12 = vpop.f32.mrf.mxu0 }
0x1d40   :  { %v3115_v57 = vrot.slane %v2958_v55, 6  ;;  %v2953_v28 = vadd.f32 %v2952_v12, %v2878_v21  ;;  %3941 = vmatpush3.msra.mxu1 %v2958_v55 }
0x1d41   :  { %3942 = vmatprep.subr.mxu1 %v4187_v1 }
0x1d42   :  { %3943 = vmatpush3.msra.mxu1 %v2953_v28  ;;  %3967 = vmatmul.mubr.msk.f32.vlgmr.msra.gmra.mxu0 %vm155_vm10, %v3115_v57 }
0x1d43   :  { %3945 = vmatmul.mubr.msk.f32.vlgmr.msra.gmra.mxu1 %vm1912_vm5, %v3542_v14  ;;  %3947 = vmatprep.subr.mxu1 %v4187_v1 }
0x1d44   :  { %3948 = vmatpush3.msra.mxu1 %v4839_v16  ;;  %3955 = vmatprep.mubr.msk.f32.mxu1 %vm4189_vm0, %v4187_v1  ;;  %v3385_v16 = vpop.permute.xlu0 %3384 }
0x1d45   :  { %3949 = vmatprep.subr.mxu1 %v4187_v1  ;;  %3984 = vmatprep.mubr.msk.f32.mxu0 %vm4189_vm0, %v4187_v1 }
0x1d46   :  { %3950 = vmatpush3.msra.mxu1 %v4845_v53  ;;  %3981 = vmatpush3.msra.mxu0 %v3304_v47  ;;  %v3308_v53 = vpop.permute.xlu1 %3307 }
0x1d47   :  { %3951 = vmatprep.subr.mxu1 %v4187_v1  ;;  %3982 = vmatprep.subr.mxu0 %v4187_v1 }
0x1d48   :  { %3952 = vmatpush3.msra.mxu1 %v4851_v56  ;;  %3983 = vmatpush3.msra.mxu0 %v3302_v18 }
0x1d49   :  { %3953 = vmatprep.subr.mxu1 %v4187_v1  ;;  %3987 = vmatprep.subr.mxu0 %v4187_v1 }
0x1d4a   :  { %3954 = vmatpush3.msra.mxu1 %v4857_v59  ;;  %v3388_v60 = vpop.permute.xlu1 %3387 }
0x1d4b   :  { %3969 = vmatprep.subr.mxu1 %v4187_v1 }
0x1e02   :  { %v3200_v2 = vpop.f32.mrf.mxu0 }
0x1e03   :  { %v3037_v62 = vpop.f32.mrf.mxu1 }
0x1e04   :  { %3956 = vmatmul.mubr.msk.f32.vlgmr.msra.gmra.mxu1 %vm155_vm10, %v3037_v62  ;;  %v3968_v38 = vpop.f32.mrf.mxu0 }
0x1e05   :  { %3970 = vmatpush3.msra.mxu1 %v3212_v45  ;;  %v3946_v3 = vpop.f32.mrf.mxu1  ;;  %3977 = vmatprep.mubr.msk.f32.mxu1 %vm4189_vm0, %v4187_v1 }
0x1e06   :  { %3971 = vmatprep.subr.mxu1 %v4187_v1 }
0x1e07   :  { %3972 = vmatpush3.msra.mxu1 %v3210_v29 }
0x1e08   :  { %3973 = vmatprep.subr.mxu1 %v4187_v1 }
0x1e09   :  { %3974 = vmatpush3.msra.mxu1 %v3208_v44 }
0x1e0a   :  { %3975 = vmatprep.subr.mxu1 %v4187_v1 }
0x1e0b   :  { %3976 = vmatpush3.msra.mxu1 %v3206_v7 }
0x1e0c   :  { %3978 = vmatmul.mubr.msk.f32.vlgmr.msra.gmra.mxu1 %vm155_vm10, %v2953_v28 }
0x1ec4   :  { %v3110_v41 = vpop.f32.mrf.mxu1 }
0x1ec5   :  { %v3204_v20 = vsub.f32 %v3110_v41, %v3200_v2 }
0x1ec6   :  { %v3957_v5 = vpop.f32.mrf.mxu1 }
0x1ecc   :  { %v3286_v22 = vpop.f32.mrf.mxu1 }
0x1ecd   :  { %v3290_v42 = vsub.f32 %v3204_v20, %v3286_v22 }
0x1ece   :  { %v3979_v23 = vpop.f32.mrf.mxu1 }
0x1ecf   :  { %v3300_v63 = vadd.f32 %v3298_v40, %v3290_v42 }
0x1ed1   :  { %3985 = vmatmul.mubr.msk.f32.vlgmr.msra.gmra.mxu0 %vm1912_vm5, %v3300_v63 }
0x1ed2   :  { %3989 = vmatprep.mubr.msk.f32.mxu0 %vm4189_vm0, %v4187_v1  ;;  %3988 = vmatpush3.msra.mxu0 %v3385_v16  ;;  %vm3469_vm0 = vcmask 1024  }
0x1f91   :  { %v3379_v56 = vpop.f32.mrf.mxu0 }
0x1f92   :  { %v3380_v59 = vadd.f32 %v3379_v56, %v3308_v53 }
0x1f93   :  { %v3986_v35 = vpop.f32.mrf.mxu0 }
0x1f94   :  { %v3383_v24 = vmax.f32 %v3380_v59, 0.0 }
0x1f96   :  { %3990 = vmatmul.mubr.msk.f32.vlgmr.msra.gmra.mxu0 %vm2843_vm6, %v3383_v24 }
0x2056   :  { %v3459_v19 = vpop.f32.mrf.mxu0 }
0x2057   :  { %v3460_v61 = vadd.f32 %v3459_v19, %v3388_v60 }
0x2058   :  { %v3991_v13 = vpop.f32.mrf.mxu0 }
0x2059   :  { %v3463_v51 = vsub.f32 0.0, %v3460_v61 }
0x205b   :  { %v3464_v15 = vmul.f32 1.442695, %v3463_v51 }
0x205d   :  { %4156 = vpow2.f32 %v3464_v15 }
0x206a   :  { %v4157_v0 = vpop.eup %4156 }
0x206b   :  { %v3466_v1 = vadd.f32 1.0, %v4157_v0 }
0x206d   :  { %4158 = vrcp.f32 %v3466_v1 }
0x207a   :  { %v4159_v4 = vpop.eup %4158 }
0x207b   :  { %3470 = vst.msk [vmem:[%s4926_s3] sm:$0x3] %vm3469_vm0, %v4159_v4 }
0x207c   :  { %3475 = vsyncpa [#allocation4], 1 }

</bundles_post_ra>
